<compile_context>
chip_gen: v7x
topology: tpu7x:2x2x1
jax: 0.10.0
libtpu: 0.0.40
codegen_flags: <defaults>
</compile_context>

<pallas_src>
import math

import jax
import jax.numpy as jnp
from jax.experimental import pallas as pl
from jax.experimental.pallas import tpu as pltpu


def _critic_kernel(x_ref, w1_ref, b1_ref, w2_ref, b2_ref, wq_ref, bq_ref,
                   o_ref, h1_acc):
    k = pl.program_id(1)

    @pl.when(k == 0)
    def _():
        h1_acc[...] = jnp.zeros_like(h1_acc)

    # fc1 partial product for this K chunk: x is DMA'd as f32 and packed to
    # bf16 on the (otherwise idle) VPU immediately before the MXU dot;
    # accumulation stays f32 in VMEM scratch.
    h1_acc[...] += jnp.dot(x_ref[...].astype(jnp.bfloat16), w1_ref[...],
                           preferred_element_type=jnp.float32)

    @pl.when(k == pl.num_programs(1) - 1)
    def _():
        # Epilogue stays strictly f32 on the VPU (v5e has no bf16 VPU math);
        # operands are packed to bf16 only right before each MXU dot.
        h1 = jnp.maximum(h1_acc[...] + b1_ref[...], 0.0)
        h2 = jnp.dot(h1.astype(jnp.bfloat16), w2_ref[...],
                     preferred_element_type=jnp.float32)
        h2 = jnp.maximum(h2 + b2_ref[...], 0.0)
        # q head: wq is zero-padded to 128 output lanes, so this is one
        # well-shaped MXU pass and the store below is an unmasked, lane-dense
        # vst (instead of the old (tm, 8, 512) VPU broadcast temp).
        q = jnp.dot(h2.astype(jnp.bfloat16), wq_ref[...],
                    preferred_element_type=jnp.float32)
        o_ref[...] = q + bq_ref[...]


def _round_up(x, m):
    return -(-x // m) * m


def _vmem_capacity_bytes():
    try:
        return int(pltpu.get_tpu_info().vmem_capacity_bytes)
    except Exception:
        pass
    try:
        kind = jax.devices()[0].device_kind.lower()
        if "7" in kind:           # TPU7x: 64 MiB VMEM per TensorCore
            return 64 << 20
    except Exception:
        pass
    return 128 << 20              # v5e / v6e tier


def prepare_critic_params(params):
    """One-time layout/dtype prep (keep OUT of the per-step hot path):
    bf16 weights for the MXU, f32 biases for the VPU epilogue, and the q-head
    weight/bias zero-padded to 128 output lanes for a lane-dense output."""
    w1, b1, w2, b2, wq, bq = params
    n_actions = wq.shape[1]
    q_pad = _round_up(max(n_actions, 1), 128)
    wq_p = jnp.pad(wq.astype(jnp.bfloat16), ((0, 0), (0, q_pad - n_actions)))
    bq_p = jnp.pad(jnp.reshape(bq, (1, -1)).astype(jnp.float32),
                   ((0, 0), (0, q_pad - n_actions)))
    return {
        "w1": w1.astype(jnp.bfloat16),
        "b1": jnp.reshape(b1, (1, -1)).astype(jnp.float32),
        "w2": w2.astype(jnp.bfloat16),
        "b2": jnp.reshape(b2, (1, -1)).astype(jnp.float32),
        "wq": wq_p,
        "bq": bq_p,
        "n_actions": n_actions,
    }


def critic_network_forward(state_nchw, prepared):
    """state_nchw: (B, 3, H, W) float32. Returns (B, n_actions) float32."""
    w1, b1 = prepared["w1"], prepared["b1"]
    w2, b2 = prepared["w2"], prepared["b2"]
    wq, bq = prepared["wq"], prepared["bq"]
    n_actions = prepared["n_actions"]

    B = state_nchw.shape[0]
    x = state_nchw.reshape(B, -1).astype(jnp.float32)   # flatten(start_dim=1)
    in_dim = x.shape[1]
    assert in_dim == w1.shape[0], (in_dim, w1.shape)
    fc1_dims, fc2_dims = w1.shape[1], w2.shape[1]
    q_pad = wq.shape[1]

    # ---- K (in_dim) tiling for fc1 -----------------------------------------
    if in_dim % 128 == 0 and in_dim > 2048:
        tk = 2048
        while in_dim % tk:      # largest 128-multiple <= 2048 dividing in_dim
            tk -= 128
    else:
        # TODO(synk): for huge in_dim that is not a 128-multiple, zero-pad x/w1
        # along K once (in prepare_critic_params) so fc1 can still be chunked.
        tk = in_dim
    nk = in_dim // tk

    # ---- batch tiling: fit the chip VMEM budget, >=2 tiles when B >= 16 ----
    vmem_cap = _vmem_capacity_bytes()
    vmem_budget = (vmem_cap - (12 << 20)) if vmem_cap <= (64 << 20) \
        else (vmem_cap - (24 << 20))

    def per_iter_bytes(tm, const_bufs):
        w1_bufs = const_bufs if nk == 1 else 2
        b = 2 * tm * tk * 4                              # x blocks (f32, 2-buf)
        b += 2 * tm * q_pad * 4                          # out blocks (2-buf)
        b += w1_bufs * tk * fc1_dims * 2                 # w1 chunk (bf16)
        b += const_bufs * (fc1_dims * 4                  # b1
                           + fc1_dims * fc2_dims * 2     # w2 (bf16)
                           + fc2_dims * 4                # b2
                           + fc2_dims * q_pad * 2        # wq (bf16)
                           + q_pad * 4)                  # bq
        b += tm * fc1_dims * 4                           # h1 f32 accumulator
        b += tm * (fc1_dims * 6 + fc2_dims * 6 + q_pad * 4)  # kernel temps
        return b

    b_pad8 = _round_up(max(B, 1), 8)
    tm = min(512, b_pad8)
    if b_pad8 >= 16:             # ensure >= 2 batch tiles (v7x: 2 TensorCores)
        tm = min(tm, _round_up(b_pad8 // 2, 8))
    while tm > 8 and per_iter_bytes(tm, 2) > vmem_budget:
        tm = max(8, (tm // 2 // 8) * 8)

    grid = (pl.cdiv(B, tm), nk)

    flops = 2 * grid[0] * tm * (in_dim * fc1_dims + fc1_dims * fc2_dims
                                + fc2_dims * q_pad)
    bytes_accessed = (B * in_dim * 4 + (w1.size + w2.size + wq.size) * 2
                      + (b1.size + b2.size + bq.size) * 4 + B * q_pad * 4)

    def build(single_buffer_consts):
        const_kw = {"pipeline_mode": pl.Buffered(1)} if single_buffer_consts else {}
        const_bufs = 1 if single_buffer_consts else 2

        def const_spec(shape):
            return pl.BlockSpec(shape, lambda i, k: (0,) * len(shape), **const_kw)

        if nk == 1:
            w1_spec = const_spec((tk, fc1_dims))
        else:
            w1_spec = pl.BlockSpec((tk, fc1_dims), lambda i, k: (k, 0))

        vmem_limit = int(min(vmem_budget,
                             max(16 << 20,
                                 per_iter_bytes(tm, const_bufs) + (4 << 20))))

        return pl.pallas_call(
            _critic_kernel,
            out_shape=jax.ShapeDtypeStruct((B, q_pad), jnp.float32),
            grid=grid,
            in_specs=[
                pl.BlockSpec((tm, tk), lambda i, k: (i, k)),   # x: streamed
                w1_spec,
                const_spec((1, fc1_dims)),
                const_spec((fc1_dims, fc2_dims)),
                const_spec((1, fc2_dims)),
                const_spec((fc2_dims, q_pad)),
                const_spec((1, q_pad)),
            ],
            out_specs=pl.BlockSpec((tm, q_pad), lambda i, k: (i, 0)),
            scratch_shapes=[pltpu.VMEM((tm, fc1_dims), jnp.float32)],
            compiler_params=pltpu.CompilerParams(
                dimension_semantics=("parallel", "arbitrary"),
                vmem_limit_bytes=vmem_limit),
            cost_estimate=pl.CostEstimate(
                flops=int(flops), transcendentals=0,
                bytes_accessed=int(bytes_accessed)),
        )

    args = (x, w1, b1, w2, b2, wq, bq)
    try:
        out = build(True)(*args)
    except Exception:
        # pipeline_mode=pl.Buffered(1) unavailable on this jax/Mosaic build:
        # fall back to default double-buffered constant inputs.
        out = build(False)(*args)

    return out[:, :n_actions]


def init_params(key, img_height, img_width, n_actions, fc1_dims=256, fc2_dims=512):
    """PyTorch-style uniform(-1/sqrt(fan_in), 1/sqrt(fan_in)) init.
    Weights stored as (in_features, out_features); biases as (1, out_features)."""
    in_dim = img_height * img_width * 3

    def linear_init(k, fan_in, fan_out):
        kw, kb = jax.random.split(k)
        bound = 1.0 / math.sqrt(fan_in)
        w = jax.random.uniform(kw, (fan_in, fan_out), jnp.float32, -bound, bound)
        b = jax.random.uniform(kb, (1, fan_out), jnp.float32, -bound, bound)
        return w, b

    k1, k2, k3 = jax.random.split(key, 3)
    w1, b1 = linear_init(k1, in_dim, fc1_dims)
    w2, b2 = linear_init(k2, fc1_dims, fc2_dims)
    wq, bq = linear_init(k3, fc2_dims, n_actions)
    return (w1, b1, w2, b2, wq, bq)


def reference_forward_f32(state_nchw, params):
    w1, b1, w2, b2, wq, bq = params
    x = state_nchw.reshape(state_nchw.shape[0], -1).astype(jnp.float32)
    h1 = jnp.maximum(x @ w1 + b1, 0.0)
    h2 = jnp.maximum(h1 @ w2 + b2, 0.0)
    return h2 @ wq + bq


def reference_forward_bf16(state_nchw, params):
    """Mirrors the kernel: bf16 MXU operands, f32 accumulation, f32 epilogue."""
    w1, b1, w2, b2, wq, bq = params
    x = state_nchw.reshape(state_nchw.shape[0], -1).astype(jnp.bfloat16)
    h1 = jnp.dot(x, w1.astype(jnp.bfloat16), preferred_element_type=jnp.float32)
    h1 = jnp.maximum(h1 + b1, 0.0)
    h2 = jnp.dot(h1.astype(jnp.bfloat16), w2.astype(jnp.bfloat16),
                 preferred_element_type=jnp.float32)
    h2 = jnp.maximum(h2 + b2, 0.0)
    q = jnp.dot(h2.astype(jnp.bfloat16), wq.astype(jnp.bfloat16),
                preferred_element_type=jnp.float32)
    return q + bq


if __name__ == "__main__":
    key = jax.random.PRNGKey(0)
    k_params, k_state = jax.random.split(key)

    B, C, H, W = 2, 3, 16, 16       # CriticNetwork expects 3-channel images
    N_ACTIONS = 4
    params = init_params(k_params, H, W, N_ACTIONS, fc1_dims=256, fc2_dims=512)
    prepared = prepare_critic_params(params)   # one-time weight prep
    state = jax.random.normal(k_state, (B, C, H, W), jnp.float32)

    q = critic_network_forward(state, prepared)
    jax.block_until_ready(q)
    assert q.shape == (B, N_ACTIONS), q.shape

    # Tight check against a reference that matches the kernel's bf16 casts.
    q_bf_ref = reference_forward_bf16(state, params)
    assert jnp.allclose(q, q_bf_ref, atol=2e-3, rtol=2e-3), (q, q_bf_ref)

    # Loose check against the pure-f32 PyTorch-equivalent forward.
    q_f32_ref = reference_forward_f32(state, params)
    assert jnp.allclose(q, q_f32_ref, atol=2e-2, rtol=2e-2), (q, q_f32_ref)

    print("KERNEL_OK")
</pallas_src>

<mosaic_0001>
module attributes {stable_mosaic.version = 11 : i64} {
  func.func @_critic_kernel(%arg0: i32, %arg1: i32, %arg2: memref<8x768xf32, #tpu.memory_space<vmem>>, %arg3: memref<768x256xbf16, #tpu.memory_space<vmem>>, %arg4: memref<1x256xf32, #tpu.memory_space<vmem>>, %arg5: memref<256x512xbf16, #tpu.memory_space<vmem>>, %arg6: memref<1x512xf32, #tpu.memory_space<vmem>>, %arg7: memref<512x128xbf16, #tpu.memory_space<vmem>>, %arg8: memref<1x128xf32, #tpu.memory_space<vmem>>, %arg9: memref<8x128xf32, #tpu.memory_space<vmem>>, %arg10: memref<8x256xf32, #tpu.memory_space<vmem>>) attributes {dimension_semantics = [#tpu.dimension_semantics<parallel>, #tpu.dimension_semantics<arbitrary>], iteration_bounds = array<i64: 1, 1>, scalar_prefetch = 0 : i64, scratch_operands = 1 : i64, tpu.core_type = #tpu.core_type<tc>, window_params = [{transform_indices = @transform_0, window_bounds = array<i64: 8, 768>}, {pipeline_mode = #tpu.pipeline_mode<synchronous>, transform_indices = @transform_1, window_bounds = array<i64: 768, 256>}, {pipeline_mode = #tpu.pipeline_mode<synchronous>, transform_indices = @transform_2, window_bounds = array<i64: 1, 256>}, {pipeline_mode = #tpu.pipeline_mode<synchronous>, transform_indices = @transform_3, window_bounds = array<i64: 256, 512>}, {pipeline_mode = #tpu.pipeline_mode<synchronous>, transform_indices = @transform_4, window_bounds = array<i64: 1, 512>}, {pipeline_mode = #tpu.pipeline_mode<synchronous>, transform_indices = @transform_5, window_bounds = array<i64: 512, 128>}, {pipeline_mode = #tpu.pipeline_mode<synchronous>, transform_indices = @transform_6, window_bounds = array<i64: 1, 128>}, {transform_indices = @transform_7, window_bounds = array<i64: 8, 128>}]} {
    %c0_i32 = arith.constant 0 : i32
    %0 = arith.cmpi eq, %arg1, %c0_i32 : i32
    %1 = arith.extui %0 : i1 to i32
    %c0_i32_0 = arith.constant 0 : i32
    %2 = arith.cmpi ne, %1, %c0_i32_0 : i32
    scf.if %2 {
      %cst_10 = arith.constant 0.000000e+00 : f32
      %13 = vector.broadcast %cst_10 : f32 to vector<8x256xf32>
      %c0_11 = arith.constant 0 : index
      %c0_12 = arith.constant 0 : index
      %14 = vector.load %arg10[%c0_11, %c0_12] : memref<8x256xf32, #tpu.memory_space<vmem>>, vector<8x256xf32>
      tpu.vector_store %arg10[%c0_11, %c0_12], %13 {strides = array<i32>} : memref<8x256xf32, #tpu.memory_space<vmem>>, vector<8x256xf32>,
    } else {
    }
    %c0 = arith.constant 0 : index
    %c0_1 = arith.constant 0 : index
    %3 = vector.load %arg10[%c0, %c0_1] : memref<8x256xf32, #tpu.memory_space<vmem>>, vector<8x256xf32>
    %c0_2 = arith.constant 0 : index
    %c0_3 = arith.constant 0 : index
    %4 = vector.load %arg2[%c0_2, %c0_3] : memref<8x768xf32, #tpu.memory_space<vmem>>, vector<8x768xf32>
    %5 = arith.truncf %4 : vector<8x768xf32> to vector<8x768xbf16>
    %c0_4 = arith.constant 0 : index
    %c0_5 = arith.constant 0 : index
    %6 = vector.load %arg3[%c0_4, %c0_5] : memref<768x256xbf16, #tpu.memory_space<vmem>>, vector<768x256xbf16>
    %cst = arith.constant dense<0.000000e+00> : vector<8x256xf32>
    %7 = tpu.matmul %5, %6, %cst {dimension_numbers = #tpu.dot_dimension_numbers<[1], [0], [0], [1], [0, 0, 1, 1], [], []>} : vector<8x768xbf16>, vector<768x256xbf16>, vector<8x256xf32> -> vector<8x256xf32>
    %8 = arith.addf %3, %7 : vector<8x256xf32>
    %c0_6 = arith.constant 0 : index
    %c0_7 = arith.constant 0 : index
    %9 = vector.load %arg10[%c0_6, %c0_7] : memref<8x256xf32, #tpu.memory_space<vmem>>, vector<8x256xf32>
    tpu.vector_store %arg10[%c0_6, %c0_7], %8 {strides = array<i32>} : memref<8x256xf32, #tpu.memory_space<vmem>>, vector<8x256xf32>,
    %c0_i32_8 = arith.constant 0 : i32
    %10 = arith.cmpi eq, %arg1, %c0_i32_8 : i32
    %11 = arith.extui %10 : i1 to i32
    %c0_i32_9 = arith.constant 0 : i32
    %12 = arith.cmpi ne, %11, %c0_i32_9 : i32
    scf.if %12 {
      %c0_10 = arith.constant 0 : index
      %c0_11 = arith.constant 0 : index
      %13 = vector.load %arg10[%c0_10, %c0_11] : memref<8x256xf32, #tpu.memory_space<vmem>>, vector<8x256xf32>
      %c0_12 = arith.constant 0 : index
      %c0_13 = arith.constant 0 : index
      %14 = vector.load %arg4[%c0_12, %c0_13] : memref<1x256xf32, #tpu.memory_space<vmem>>, vector<1x256xf32>
      %15 = vector.broadcast %14 : vector<1x256xf32> to vector<8x256xf32>
      %16 = arith.addf %13, %15 : vector<8x256xf32>
      %cst_14 = arith.constant 0.000000e+00 : f32
      %17 = vector.broadcast %cst_14 : f32 to vector<8x256xf32>
      %18 = arith.maximumf %16, %17 : vector<8x256xf32>
      %19 = arith.truncf %18 : vector<8x256xf32> to vector<8x256xbf16>
      %c0_15 = arith.constant 0 : index
      %c0_16 = arith.constant 0 : index
      %20 = vector.load %arg5[%c0_15, %c0_16] : memref<256x512xbf16, #tpu.memory_space<vmem>>, vector<256x512xbf16>
      %cst_17 = arith.constant dense<0.000000e+00> : vector<8x512xf32>
      %21 = tpu.matmul %19, %20, %cst_17 {dimension_numbers = #tpu.dot_dimension_numbers<[1], [0], [0], [1], [0, 0, 1, 1], [], []>} : vector<8x256xbf16>, vector<256x512xbf16>, vector<8x512xf32> -> vector<8x512xf32>
      %c0_18 = arith.constant 0 : index
      %c0_19 = arith.constant 0 : index
      %22 = vector.load %arg6[%c0_18, %c0_19] : memref<1x512xf32, #tpu.memory_space<vmem>>, vector<1x512xf32>
      %23 = vector.broadcast %22 : vector<1x512xf32> to vector<8x512xf32>
      %24 = arith.addf %21, %23 : vector<8x512xf32>
      %cst_20 = arith.constant 0.000000e+00 : f32
      %25 = vector.broadcast %cst_20 : f32 to vector<8x512xf32>
      %26 = arith.maximumf %24, %25 : vector<8x512xf32>
      %27 = arith.truncf %26 : vector<8x512xf32> to vector<8x512xbf16>
      %c0_21 = arith.constant 0 : index
      %c0_22 = arith.constant 0 : index
      %28 = vector.load %arg7[%c0_21, %c0_22] : memref<512x128xbf16, #tpu.memory_space<vmem>>, vector<512x128xbf16>
      %cst_23 = arith.constant dense<0.000000e+00> : vector<8x128xf32>
      %29 = tpu.matmul %27, %28, %cst_23 {dimension_numbers = #tpu.dot_dimension_numbers<[1], [0], [0], [1], [0, 0, 1, 1], [], []>} : vector<8x512xbf16>, vector<512x128xbf16>, vector<8x128xf32> -> vector<8x128xf32>
      %c0_24 = arith.constant 0 : index
      %c0_25 = arith.constant 0 : index
      %30 = vector.load %arg8[%c0_24, %c0_25] : memref<1x128xf32, #tpu.memory_space<vmem>>, vector<1x128xf32>
      %31 = vector.broadcast %30 : vector<1x128xf32> to vector<8x128xf32>
      %32 = arith.addf %29, %31 : vector<8x128xf32>
      %c0_26 = arith.constant 0 : index
      %c0_27 = arith.constant 0 : index
      %33 = vector.load %arg9[%c0_26, %c0_27] : memref<8x128xf32, #tpu.memory_space<vmem>>, vector<8x128xf32>
      tpu.vector_store %arg9[%c0_26, %c0_27], %32 {strides = array<i32>} : memref<8x128xf32, #tpu.memory_space<vmem>>, vector<8x128xf32>,
    } else {
    }
    return
  }
  func.func @transform_0(%arg0: i32, %arg1: i32) -> (i32, i32) {
    %c0_i32 = arith.constant 0 : i32
    return %arg0, %arg1 : i32, i32
  }
  func.func @transform_1(%arg0: i32, %arg1: i32) -> (i32, i32) {
    %c0_i32 = arith.constant 0 : i32
    %c0_i32_0 = arith.constant 0 : i32
    %c0_i32_1 = arith.constant 0 : i32
    return %c0_i32, %c0_i32_0 : i32, i32
  }
  func.func @transform_2(%arg0: i32, %arg1: i32) -> (i32, i32) {
    %c0_i32 = arith.constant 0 : i32
    %c0_i32_0 = arith.constant 0 : i32
    %c0_i32_1 = arith.constant 0 : i32
    return %c0_i32, %c0_i32_0 : i32, i32
  }
  func.func @transform_3(%arg0: i32, %arg1: i32) -> (i32, i32) {
    %c0_i32 = arith.constant 0 : i32
    %c0_i32_0 = arith.constant 0 : i32
    %c0_i32_1 = arith.constant 0 : i32
    return %c0_i32, %c0_i32_0 : i32, i32
  }
  func.func @transform_4(%arg0: i32, %arg1: i32) -> (i32, i32) {
    %c0_i32 = arith.constant 0 : i32
    %c0_i32_0 = arith.constant 0 : i32
    %c0_i32_1 = arith.constant 0 : i32
    return %c0_i32, %c0_i32_0 : i32, i32
  }
  func.func @transform_5(%arg0: i32, %arg1: i32) -> (i32, i32) {
    %c0_i32 = arith.constant 0 : i32
    %c0_i32_0 = arith.constant 0 : i32
    %c0_i32_1 = arith.constant 0 : i32
    return %c0_i32, %c0_i32_0 : i32, i32
  }
  func.func @transform_6(%arg0: i32, %arg1: i32) -> (i32, i32) {
    %c0_i32 = arith.constant 0 : i32
    %c0_i32_0 = arith.constant 0 : i32
    %c0_i32_1 = arith.constant 0 : i32
    return %c0_i32, %c0_i32_0 : i32, i32
  }
  func.func @transform_7(%arg0: i32, %arg1: i32) -> (i32, i32) {
    %c0_i32 = arith.constant 0 : i32
    %c0_i32_0 = arith.constant 0 : i32
    return %arg0, %c0_i32 : i32, i32
  }
}

module attributes {stable_mosaic.version = 11 : i64} {
  func.func @_critic_kernel(%arg0: i32, %arg1: i32, %arg2: memref<8x768xf32, #tpu.memory_space<vmem>>, %arg3: memref<768x256xbf16, #tpu.memory_space<vmem>>, %arg4: memref<1x256xf32, #tpu.memory_space<vmem>>, %arg5: memref<256x512xbf16, #tpu.memory_space<vmem>>, %arg6: memref<1x512xf32, #tpu.memory_space<vmem>>, %arg7: memref<512x128xbf16, #tpu.memory_space<vmem>>, %arg8: memref<1x128xf32, #tpu.memory_space<vmem>>, %arg9: memref<8x128xf32, #tpu.memory_space<vmem>>, %arg10: memref<8x256xf32, #tpu.memory_space<vmem>>) attributes {dimension_semantics = [#tpu.dimension_semantics<parallel>, #tpu.dimension_semantics<arbitrary>], iteration_bounds = array<i64: 1, 1>, scalar_prefetch = 0 : i64, scratch_operands = 1 : i64, tpu.core_type = #tpu.core_type<tc>, window_params = [{transform_indices = @transform_0, window_bounds = array<i64: 8, 768>}, {pipeline_mode = #tpu.pipeline_mode<synchronous>, transform_indices = @transform_1, window_bounds = array<i64: 768, 256>}, {pipeline_mode = #tpu.pipeline_mode<synchronous>, transform_indices = @transform_2, window_bounds = array<i64: 1, 256>}, {pipeline_mode = #tpu.pipeline_mode<synchronous>, transform_indices = @transform_3, window_bounds = array<i64: 256, 512>}, {pipeline_mode = #tpu.pipeline_mode<synchronous>, transform_indices = @transform_4, window_bounds = array<i64: 1, 512>}, {pipeline_mode = #tpu.pipeline_mode<synchronous>, transform_indices = @transform_5, window_bounds = array<i64: 512, 128>}, {pipeline_mode = #tpu.pipeline_mode<synchronous>, transform_indices = @transform_6, window_bounds = array<i64: 1, 128>}, {transform_indices = @transform_7, window_bounds = array<i64: 8, 128>}]} {
    %c0_i32 = arith.constant 0 : i32
    %0 = arith.cmpi eq, %arg1, %c0_i32 : i32
    %1 = arith.extui %0 : i1 to i32
    %c0_i32_0 = arith.constant 0 : i32
    %2 = arith.cmpi ne, %1, %c0_i32_0 : i32
    scf.if %2 {
      %cst_10 = arith.constant 0.000000e+00 : f32
      %13 = vector.broadcast %cst_10 : f32 to vector<8x256xf32>
      %c0_11 = arith.constant 0 : index
      %c0_12 = arith.constant 0 : index
      %14 = vector.load %arg10[%c0_11, %c0_12] : memref<8x256xf32, #tpu.memory_space<vmem>>, vector<8x256xf32>
      tpu.vector_store %arg10[%c0_11, %c0_12], %13 {strides = array<i32>} : memref<8x256xf32, #tpu.memory_space<vmem>>, vector<8x256xf32>,
    } else {
    }
    %c0 = arith.constant 0 : index
    %c0_1 = arith.constant 0 : index
    %3 = vector.load %arg10[%c0, %c0_1] : memref<8x256xf32, #tpu.memory_space<vmem>>, vector<8x256xf32>
    %c0_2 = arith.constant 0 : index
    %c0_3 = arith.constant 0 : index
    %4 = vector.load %arg2[%c0_2, %c0_3] : memref<8x768xf32, #tpu.memory_space<vmem>>, vector<8x768xf32>
    %5 = arith.truncf %4 : vector<8x768xf32> to vector<8x768xbf16>
    %c0_4 = arith.constant 0 : index
    %c0_5 = arith.constant 0 : index
    %6 = vector.load %arg3[%c0_4, %c0_5] : memref<768x256xbf16, #tpu.memory_space<vmem>>, vector<768x256xbf16>
    %cst = arith.constant dense<0.000000e+00> : vector<8x256xf32>
    %7 = tpu.matmul %5, %6, %cst {dimension_numbers = #tpu.dot_dimension_numbers<[1], [0], [0], [1], [0, 0, 1, 1], [], []>} : vector<8x768xbf16>, vector<768x256xbf16>, vector<8x256xf32> -> vector<8x256xf32>
    %8 = arith.addf %3, %7 : vector<8x256xf32>
    %c0_6 = arith.constant 0 : index
    %c0_7 = arith.constant 0 : index
    %9 = vector.load %arg10[%c0_6, %c0_7] : memref<8x256xf32, #tpu.memory_space<vmem>>, vector<8x256xf32>
    tpu.vector_store %arg10[%c0_6, %c0_7], %8 {strides = array<i32>} : memref<8x256xf32, #tpu.memory_space<vmem>>, vector<8x256xf32>,
    %c0_i32_8 = arith.constant 0 : i32
    %10 = arith.cmpi eq, %arg1, %c0_i32_8 : i32
    %11 = arith.extui %10 : i1 to i32
    %c0_i32_9 = arith.constant 0 : i32
    %12 = arith.cmpi ne, %11, %c0_i32_9 : i32
    scf.if %12 {
      %c0_10 = arith.constant 0 : index
      %c0_11 = arith.constant 0 : index
      %13 = vector.load %arg10[%c0_10, %c0_11] : memref<8x256xf32, #tpu.memory_space<vmem>>, vector<8x256xf32>
      %c0_12 = arith.constant 0 : index
      %c0_13 = arith.constant 0 : index
      %14 = vector.load %arg4[%c0_12, %c0_13] : memref<1x256xf32, #tpu.memory_space<vmem>>, vector<1x256xf32>
      %15 = vector.broadcast %14 : vector<1x256xf32> to vector<8x256xf32>
      %16 = arith.addf %13, %15 : vector<8x256xf32>
      %cst_14 = arith.constant 0.000000e+00 : f32
      %17 = vector.broadcast %cst_14 : f32 to vector<8x256xf32>
      %18 = arith.maximumf %16, %17 : vector<8x256xf32>
      %19 = arith.truncf %18 : vector<8x256xf32> to vector<8x256xbf16>
      %c0_15 = arith.constant 0 : index
      %c0_16 = arith.constant 0 : index
      %20 = vector.load %arg5[%c0_15, %c0_16] : memref<256x512xbf16, #tpu.memory_space<vmem>>, vector<256x512xbf16>
      %cst_17 = arith.constant dense<0.000000e+00> : vector<8x512xf32>
      %21 = tpu.matmul %19, %20, %cst_17 {dimension_numbers = #tpu.dot_dimension_numbers<[1], [0], [0], [1], [0, 0, 1, 1], [], []>} : vector<8x256xbf16>, vector<256x512xbf16>, vector<8x512xf32> -> vector<8x512xf32>
      %c0_18 = arith.constant 0 : index
      %c0_19 = arith.constant 0 : index
      %22 = vector.load %arg6[%c0_18, %c0_19] : memref<1x512xf32, #tpu.memory_space<vmem>>, vector<1x512xf32>
      %23 = vector.broadcast %22 : vector<1x512xf32> to vector<8x512xf32>
      %24 = arith.addf %21, %23 : vector<8x512xf32>
      %cst_20 = arith.constant 0.000000e+00 : f32
      %25 = vector.broadcast %cst_20 : f32 to vector<8x512xf32>
      %26 = arith.maximumf %24, %25 : vector<8x512xf32>
      %27 = arith.truncf %26 : vector<8x512xf32> to vector<8x512xbf16>
      %c0_21 = arith.constant 0 : index
      %c0_22 = arith.constant 0 : index
      %28 = vector.load %arg7[%c0_21, %c0_22] : memref<512x128xbf16, #tpu.memory_space<vmem>>, vector<512x128xbf16>
      %cst_23 = arith.constant dense<0.000000e+00> : vector<8x128xf32>
      %29 = tpu.matmul %27, %28, %cst_23 {dimension_numbers = #tpu.dot_dimension_numbers<[1], [0], [0], [1], [0, 0, 1, 1], [], []>} : vector<8x512xbf16>, vector<512x128xbf16>, vector<8x128xf32> -> vector<8x128xf32>
      %c0_24 = arith.constant 0 : index
      %c0_25 = arith.constant 0 : index
      %30 = vector.load %arg8[%c0_24, %c0_25] : memref<1x128xf32, #tpu.memory_space<vmem>>, vector<1x128xf32>
      %31 = vector.broadcast %30 : vector<1x128xf32> to vector<8x128xf32>
      %32 = arith.addf %29, %31 : vector<8x128xf32>
      %c0_26 = arith.constant 0 : index
      %c0_27 = arith.constant 0 : index
      %33 = vector.load %arg9[%c0_26, %c0_27] : memref<8x128xf32, #tpu.memory_space<vmem>>, vector<8x128xf32>
      tpu.vector_store %arg9[%c0_26, %c0_27], %32 {strides = array<i32>} : memref<8x128xf32, #tpu.memory_space<vmem>>, vector<8x128xf32>,
    } else {
    }
    return
  }
  func.func @transform_0(%arg0: i32, %arg1: i32) -> (i32, i32) {
    %c0_i32 = arith.constant 0 : i32
    return %arg0, %arg1 : i32, i32
  }
  func.func @transform_1(%arg0: i32, %arg1: i32) -> (i32, i32) {
    %c0_i32 = arith.constant 0 : i32
    %c0_i32_0 = arith.constant 0 : i32
    %c0_i32_1 = arith.constant 0 : i32
    return %c0_i32, %c0_i32_0 : i32, i32
  }
  func.func @transform_2(%arg0: i32, %arg1: i32) -> (i32, i32) {
    %c0_i32 = arith.constant 0 : i32
    %c0_i32_0 = arith.constant 0 : i32
    %c0_i32_1 = arith.constant 0 : i32
    return %c0_i32, %c0_i32_0 : i32, i32
  }
  func.func @transform_3(%arg0: i32, %arg1: i32) -> (i32, i32) {
    %c0_i32 = arith.constant 0 : i32
    %c0_i32_0 = arith.constant 0 : i32
    %c0_i32_1 = arith.constant 0 : i32
    return %c0_i32, %c0_i32_0 : i32, i32
  }
  func.func @transform_4(%arg0: i32, %arg1: i32) -> (i32, i32) {
    %c0_i32 = arith.constant 0 : i32
    %c0_i32_0 = arith.constant 0 : i32
    %c0_i32_1 = arith.constant 0 : i32
    return %c0_i32, %c0_i32_0 : i32, i32
  }
  func.func @transform_5(%arg0: i32, %arg1: i32) -> (i32, i32) {
    %c0_i32 = arith.constant 0 : i32
    %c0_i32_0 = arith.constant 0 : i32
    %c0_i32_1 = arith.constant 0 : i32
    return %c0_i32, %c0_i32_0 : i32, i32
  }
  func.func @transform_6(%arg0: i32, %arg1: i32) -> (i32, i32) {
    %c0_i32 = arith.constant 0 : i32
    %c0_i32_0 = arith.constant 0 : i32
    %c0_i32_1 = arith.constant 0 : i32
    return %c0_i32, %c0_i32_0 : i32, i32
  }
  func.func @transform_7(%arg0: i32, %arg1: i32) -> (i32, i32) {
    %c0_i32 = arith.constant 0 : i32
    %c0_i32_0 = arith.constant 0 : i32
    return %arg0, %c0_i32 : i32, i32
  }
}

</mosaic_0001>

<bundles_post_ra>
// kernel: tpu_custom_call.1
= control target key start
LH: loop header
LB: loop body
LE: loop exit
PB: predicated region body
PF: predicated region fallthrough
CT: control target
= control target key end

     0   :  { %12 = vsyncpa [#allocation4], 0  ;;  %s2549_s0 = inlined_call_operand.hbm [shape: f32[2,768], index: 0, kind: input, shape index: {}]   ;;  %s2550_s1 = inlined_call_operand.hbm [shape: bf16[768,256], index: 1, kind: input, shape index: {}]   ;;  %s2551_s2 = inlined_call_operand.vmem [shape: f32[1,256], index: 2, kind: input, shape index: {}]   ;;  %s2552_s3 = inlined_call_operand.hbm [shape: bf16[256,512], index: 3, kind: input, shape index: {}]   ;;  %s2553_s4 = inlined_call_operand.vmem [shape: f32[1,512], index: 4, kind: input, shape index: {}]   ;;  %s2554_s5 = inlined_call_operand.hbm [shape: bf16[512,128], index: 5, kind: input, shape index: {}]   ;;  %s2555_s6 = inlined_call_operand.vmem [shape: f32[1,128], index: 6, kind: input, shape index: {}]   ;;  %s2556_s7 = inlined_call_operand.hbm [shape: f32[2,128], index: 7, kind: output, shape index: {}]  }
   0x1   :  { %13 = vsyncpa [#allocation7], 0 }
   0x2   :  { %14 = vsyncpa [#allocation10], 0 }
   0x3   :  { %15 = vsyncpa [#allocation5], 0 }
   0x4   :  { %20 = vsyncadd [#allocation4], 576  ;;  %s2409_s24 = smov [#allocation6]   ;;  %s2291_s28 = scalar_lea.hbm %s2550_s1, 12288 }
   0x5   :  { %s33_s25 = sshll.u32 %s2409_s24, 4  ;;  %p2292_p0 = scmp.ne.s32.totalorder %s2550_s1, %s2291_s28  ;;  %s34_s25 = int_to_ptr.vmem [resolvable:$true] %s33_s25 }
   0x6   :  { %p2295_p1 = scmp.lt.u32.totalorder %s2291_s28, %s2550_s1 }
   0x8   :  { %p2297_p2 = pnand %p2295_p1, %p2292_p0 }
   0xa   :  { %2300 = shalt.err (!%p2297_p2)
}
   0xb   :  { %s2301_s10 = scalar_lea.vmem %s34_s25, 12288  ;;  %p2306_p4 = scmp.lt.s32.totalorder %s34_s25, %s34_s25 }
   0xc   :  { %p2302_p3 = scmp.ne.s32.totalorder %s34_s25, %s2301_s10  ;;  %p2307_p5 = scmp.lt.s32.totalorder %s2301_s10, %s2301_s10 }
   0xe   :  { %p2308_p6 = por %p2307_p5, %p2306_p4 }
  0x10   :  { %p2309_p7 = pnand %p2308_p6, %p2302_p3 }
  0x12   :  { %2312 = shalt.err (!%p2309_p7)
}
  0x13   :  { %s2410_s11 = smov 128   ;;  %s2411_s12 = smov 8  }
  0x14   :  { %39 = dma.hbm_to_vmem [thread:$0]  %s2550_s1, 12288, %s34_s25, [#allocation7], %s2410_s11, %s2410_s11, %s2411_s12  }
  0x15   :  { %s2412_s15 = smov [#allocation3]   ;;  %s2313_s19 = scalar_lea.hbm %s2549_s0, 192 }
  0x16   :  { %s21_s16 = sshll.u32 %s2412_s15, 4  ;;  %p2314_p8 = scmp.ne.s32.totalorder %s2549_s0, %s2313_s19  ;;  %s22_s16 = int_to_ptr.vmem [resolvable:$true] %s21_s16 }
  0x17   :  { %p2317_p9 = scmp.lt.u32.totalorder %s2313_s19, %s2549_s0 }
  0x19   :  { %p2319_p10 = pnand %p2317_p9, %p2314_p8 }
  0x1b   :  { %2322 = shalt.err (!%p2319_p10)
}
  0x1c   :  { %s2323_s24 = scalar_lea.vmem %s22_s16, 192  ;;  %s2327_s1 = scalar_lea.vmem %s22_s16, 768 }
  0x1d   :  { %p2324_p11 = scmp.ne.s32.totalorder %s22_s16, %s2323_s24  ;;  %p2328_p12 = scmp.lt.s32.totalorder %s22_s16, %s22_s16 }
  0x1e   :  { %p2329_p13 = scmp.lt.s32.totalorder %s2327_s1, %s2323_s24 }
  0x20   :  { %p2330_p0 = por %p2329_p13, %p2328_p12 }
  0x22   :  { %p2331_p1 = pnand %p2330_p0, %p2324_p11 }
  0x24   :  { %2334 = shalt.err (!%p2331_p1)
}
  0x25   :  { %s2413_s25 = smov 192   ;;  %s2414_s26 = smov 12  }
  0x26   :  { %27 = dma.hbm_to_vmem [thread:$0]  %s2549_s0, 192, %s22_s16, [#allocation4], %s2413_s25, %s2413_s25, %s2414_s26  }
  0x27   :  { %s2415_s29 = smov [#allocation8]   ;;  %s2335_s10 = scalar_lea.hbm %s2552_s3, 8192 }
  0x28   :  { %s47_s30 = sshll.u32 %s2415_s29, 4  ;;  %p2336_p2 = scmp.ne.s32.totalorder %s2552_s3, %s2335_s10  ;;  %s48_s30 = int_to_ptr.vmem [resolvable:$true] %s47_s30 }
  0x29   :  { %p2339_p3 = scmp.lt.u32.totalorder %s2335_s10, %s2552_s3 }
  0x2b   :  { %p2341_p4 = pnand %p2339_p3, %p2336_p2 }
  0x2d   :  { %2344 = shalt.err (!%p2341_p4)
}
  0x2e   :  { %s2345_s15 = scalar_lea.vmem %s48_s30, 8192  ;;  %p2350_p6 = scmp.lt.s32.totalorder %s48_s30, %s48_s30 }
  0x2f   :  { %p2346_p5 = scmp.ne.s32.totalorder %s48_s30, %s2345_s15  ;;  %p2351_p7 = scmp.lt.s32.totalorder %s2345_s15, %s2345_s15 }
  0x31   :  { %p2352_p8 = por %p2351_p7, %p2350_p6 }
  0x33   :  { %p2353_p9 = pnand %p2352_p8, %p2346_p5 }
  0x35   :  { %2356 = shalt.err (!%p2353_p9)
}
  0x36   :  { %s2416_s0 = smov 256   ;;  %s2417_s16 = smov 16  }
  0x37   :  { %53 = dma.hbm_to_vmem [thread:$0]  %s2552_s3, 8192, %s48_s30, [#allocation7], %s2416_s0, %s2416_s0, %s2417_s16  }
  0x38   :  { %s2418_s19 = smov [#allocation9]   ;;  %s2357_s23 = scalar_lea.hbm %s2554_s5, 4096 }
  0x39   :  { %s61_s20 = sshll.u32 %s2418_s19, 4  ;;  %p2358_p10 = scmp.ne.s32.totalorder %s2554_s5, %s2357_s23  ;;  %s62_s20 = int_to_ptr.vmem [resolvable:$true] %s61_s20 }
  0x3a   :  { %p2361_p11 = scmp.lt.u32.totalorder %s2357_s23, %s2554_s5 }
  0x3c   :  { %p2363_p12 = pnand %p2361_p11, %p2358_p10 }
  0x3e   :  { %2366 = shalt.err (!%p2363_p12)
}
  0x3f   :  { %s2367_s27 = scalar_lea.vmem %s62_s20, 4096  ;;  %p2372_p0 = scmp.lt.s32.totalorder %s62_s20, %s62_s20 }
  0x40   :  { %p2368_p13 = scmp.ne.s32.totalorder %s62_s20, %s2367_s27  ;;  %p2373_p1 = scmp.lt.s32.totalorder %s2367_s27, %s2367_s27 }
  0x42   :  { %p2374_p2 = por %p2373_p1, %p2372_p0 }
  0x44   :  { %p2375_p3 = pnand %p2374_p2, %p2368_p13 }
  0x46   :  { %2378 = shalt.err (!%p2375_p3)
}
  0x47   :  { %s2419_s3 = smov 64   ;;  %s2420_s28 = smov 4  }
  0x48   :  { %67 = dma.hbm_to_vmem [thread:$0]  %s2554_s5, 4096, %s62_s20, [#allocation10], %s2419_s3, %s2419_s3, %s2420_s28  }
  0x49   :  { %2401 = dma.done.wait [#allocation4], 768  }
  0x4a   :  { %2402 = vsyncadd [#allocation4], 4294966528 }
  0x4b   :  { %2403 = dma.done.wait [#allocation7], 20480  }
  0x4c   :  { %2404 = vsyncadd [#allocation7], 4294946816 }
  0x4d   :  { %2405 = dma.done.wait [#allocation10], 4096  }
  0x4e   :  { %2406 = vsyncadd [#allocation10], 4294963200  ;;  %v2011_v0 = vld [vmem:[#allocation6 + $0x4] ss:$8 sps:$4 sm:$0xff]   ;;  %v2015_v2 = vld [vmem:[#allocation6] ss:$8 sps:$4 sm:$0xff]   ;;  %v114_v40 = vlaneseq }
  0x4f   :  { %v2013_v1 = vld [vmem:[#allocation6 + $0x104] ss:$8 sps:$4 sm:$0xff]   ;;  %749 = vmatprep.subr.bf16.mxu0 %v2011_v0  ;;  %v2016_v3 = vld [vmem:[#allocation6 + $0x100] ss:$8 sps:$4 sm:$0xff]   ;;  %v2017_v4 = vld [vmem:[#allocation6 + $0x14] ss:$8 sps:$4 sm:$0xff]  }
  0x50   :  { %790 = vmatprep.subr.bf16.mxu1 %v2013_v1  ;;  %750 = vmatpush1.bf16.msra.mxu0 %v2015_v2  ;;  %v2019_v5 = vld [vmem:[#allocation6 + $0x114] ss:$8 sps:$4 sm:$0xff]   ;;  %v2021_v6 = vld [vmem:[#allocation6 + $0x10] ss:$8 sps:$4 sm:$0xff]   ;;  %v2023_v8 = vld [vmem:[#allocation6 + $0x24] ss:$8 sps:$4 sm:$0xff]  }
  0x51   :  { %791 = vmatpush1.bf16.msra.mxu1 %v2016_v3  ;;  %751 = vmatprep.subr.bf16.mxu0 %v2017_v4  ;;  %v2022_v7 = vld [vmem:[#allocation6 + $0x110] ss:$8 sps:$4 sm:$0xff]   ;;  %v2025_v9 = vld [vmem:[#allocation6 + $0x124] ss:$8 sps:$4 sm:$0xff]   ;;  %v2027_v10 = vld [vmem:[#allocation6 + $0x20] ss:$8 sps:$4 sm:$0xff]  }
  0x52   :  { %792 = vmatprep.subr.bf16.mxu1 %v2019_v5  ;;  %v2028_v11 = vld [vmem:[#allocation6 + $0x120] ss:$8 sps:$4 sm:$0xff]   ;;  %v2029_v12 = vld [vmem:[#allocation6 + $0x34] ss:$8 sps:$4 sm:$0xff]   ;;  %v2033_v14 = vld [vmem:[#allocation6 + $0x30] ss:$8 sps:$4 sm:$0xff]  }
  0x53   :  { %v2031_v13 = vld [vmem:[#allocation6 + $0x134] ss:$8 sps:$4 sm:$0xff]   ;;  %v2034_v15 = vld [vmem:[#allocation6 + $0x130] ss:$8 sps:$4 sm:$0xff]   ;;  %v2035_v16 = vld [vmem:[#allocation6 + $0x44] ss:$8 sps:$4 sm:$0xff]  }
  0x54   :  { %752 = vmatpush1.bf16.msra.mxu0 %v2021_v6  ;;  %v2037_v17 = vld [vmem:[#allocation6 + $0x144] ss:$8 sps:$4 sm:$0xff]   ;;  %v2039_v18 = vld [vmem:[#allocation6 + $0x40] ss:$8 sps:$4 sm:$0xff]   ;;  %v2041_v20 = vld [vmem:[#allocation6 + $0x54] ss:$8 sps:$4 sm:$0xff]  }
  0x55   :  { %793 = vmatpush1.bf16.msra.mxu1 %v2022_v7  ;;  %753 = vmatprep.subr.bf16.mxu0 %v2023_v8  ;;  %v2040_v19 = vld [vmem:[#allocation6 + $0x140] ss:$8 sps:$4 sm:$0xff]   ;;  %v2043_v21 = vld [vmem:[#allocation6 + $0x154] ss:$8 sps:$4 sm:$0xff]   ;;  %v2045_v22 = vld [vmem:[#allocation6 + $0x50] ss:$8 sps:$4 sm:$0xff]  }
  0x56   :  { %794 = vmatprep.subr.bf16.mxu1 %v2025_v9  ;;  %v2046_v23 = vld [vmem:[#allocation6 + $0x150] ss:$8 sps:$4 sm:$0xff]   ;;  %v2047_v24 = vld [vmem:[#allocation6 + $0x64] ss:$8 sps:$4 sm:$0xff]   ;;  %v2051_v26 = vld [vmem:[#allocation6 + $0x60] ss:$8 sps:$4 sm:$0xff]  }
  0x57   :  { %v2049_v25 = vld [vmem:[#allocation6 + $0x164] ss:$8 sps:$4 sm:$0xff]   ;;  %v2052_v27 = vld [vmem:[#allocation6 + $0x160] ss:$8 sps:$4 sm:$0xff]   ;;  %v2053_v28 = vld [vmem:[#allocation6 + $0x74] ss:$8 sps:$4 sm:$0xff]  }
  0x58   :  { %754 = vmatpush1.bf16.msra.mxu0 %v2027_v10  ;;  %v2055_v29 = vld [vmem:[#allocation6 + $0x174] ss:$8 sps:$4 sm:$0xff]   ;;  %v2057_v30 = vld [vmem:[#allocation6 + $0x70] ss:$8 sps:$4 sm:$0xff]   ;;  %v2059_v32 = vld [vmem:[#allocation6 + $0x84] ss:$8 sps:$4 sm:$0xff]  }
  0x59   :  { %795 = vmatpush1.bf16.msra.mxu1 %v2028_v11  ;;  %755 = vmatprep.subr.bf16.mxu0 %v2029_v12  ;;  %v2058_v31 = vld [vmem:[#allocation6 + $0x170] ss:$8 sps:$4 sm:$0xff]   ;;  %v2061_v33 = vld [vmem:[#allocation6 + $0x184] ss:$8 sps:$4 sm:$0xff]   ;;  %v2063_v34 = vld [vmem:[#allocation6 + $0x80] ss:$8 sps:$4 sm:$0xff]  }
  0x5a   :  { %796 = vmatprep.subr.bf16.mxu1 %v2031_v13  ;;  %v2064_v35 = vld [vmem:[#allocation6 + $0x180] ss:$8 sps:$4 sm:$0xff]   ;;  %v2065_v36 = vld [vmem:[#allocation6 + $0x94] ss:$8 sps:$4 sm:$0xff]   ;;  %v2421_v38 = vmov 1983009808  }
  0x5b   :  { %v2067_v37 = vld [vmem:[#allocation6 + $0x194] ss:$8 sps:$4 sm:$0xff]   ;;  %v112_v39 = vunpack.c.l.s4 %v2421_v38  ;;  %v2069_v41 = vld [vmem:[#allocation6 + $0x90] ss:$8 sps:$4 sm:$0xff]   ;;  %v2071_v43 = vld [vmem:[#allocation6 + $0xa4] ss:$8 sps:$4 sm:$0xff]  }
  0x5c   :  { %756 = vmatpush1.bf16.msra.mxu0 %v2033_v14  ;;  %v2070_v42 = vld [vmem:[#allocation6 + $0x190] ss:$8 sps:$4 sm:$0xff]   ;;  %v2073_v44 = vld [vmem:[#allocation6 + $0x1a4] ss:$8 sps:$4 sm:$0xff]   ;;  %v2513_v46 = vshrl.u32 %v114_v40, 7 }
  0x5d   :  { %797 = vmatpush1.bf16.msra.mxu1 %v2034_v15  ;;  %757 = vmatprep.subr.bf16.mxu0 %v2035_v16  ;;  %v113_v45 = vunpack.c.0.s8 %v112_v39  ;;  %v2075_v47 = vld [vmem:[#allocation6 + $0xa0] ss:$8 sps:$4 sm:$0xff]   ;;  %v2077_v49 = vld [vmem:[#allocation6 + $0xb4] ss:$8 sps:$4 sm:$0xff]   ;;  %v2081_v51 = vld [vmem:[#allocation6 + $0xb0] ss:$8 sps:$4 sm:$0xff]  }
  0x5e   :  { %798 = vmatprep.subr.bf16.mxu1 %v2037_v17  ;;  %v2076_v48 = vld [vmem:[#allocation6 + $0x1a0] ss:$8 sps:$4 sm:$0xff]   ;;  %v2079_v50 = vld [vmem:[#allocation6 + $0x1b4] ss:$8 sps:$4 sm:$0xff]   ;;  %v2082_v52 = vld [vmem:[#allocation6 + $0x1b0] ss:$8 sps:$4 sm:$0xff]  }
  0x5f   :  { %v2516_v53 = vsub.s32 %v113_v45, %v2513_v46  ;;  %v2083_v54 = vld [vmem:[#allocation6 + $0xc4] ss:$8 sps:$4 sm:$0xff]   ;;  %v2107_v56 = vld [vmem:[#allocation3] ss:$12 sps:$4 sm:$0xff]   ;;  %v2109_v57 = vld [vmem:[#allocation3 + $0x18] ss:$12 sps:$4 sm:$0xff]  }
  0x60   :  { %758 = vmatpush1.bf16.msra.mxu0 %v2039_v18  ;;  %v2085_v55 = vld [vmem:[#allocation6 + $0x1c4] ss:$8 sps:$4 sm:$0xff]   ;;  %v2111_v58 = vld [vmem:[#allocation3 + $0x4] ss:$12 sps:$4 sm:$0xff]   ;;  %v2093_v7 = vld [vmem:[#allocation6 + $0xd0] ss:$8 sps:$4 sm:$0xff]  }
  0x61   :  { %799 = vmatpush1.bf16.msra.mxu1 %v2040_v19  ;;  %759 = vmatprep.subr.bf16.mxu0 %v2041_v20  ;;  %v2112_v59 = vld [vmem:[#allocation3 + $0x1c] ss:$12 sps:$4 sm:$0xff]   ;;  %v117_v60 = vrot.slane %v2107_v56, %v2516_v53  ;;  %v131_v61 = vrot.slane %v2109_v57, %v2516_v53  ;;  %v124_v62 = vrot.slane %v2111_v58, %v2516_v53  ;;  %v2087_v63 = vld [vmem:[#allocation6 + $0xc0] ss:$8 sps:$4 sm:$0xff]   ;;  %v2089_v2 = vld [vmem:[#allocation6 + $0xd4] ss:$8 sps:$4 sm:$0xff]  }
  0x62   :  { %800 = vmatprep.subr.bf16.mxu1 %v2043_v21  ;;  %v2088_v0 = vld [vmem:[#allocation6 + $0x1c0] ss:$8 sps:$4 sm:$0xff]   ;;  %v138_v1 = vrot.slane %v2112_v59, %v2516_v53  ;;  %v2091_v4 = vld [vmem:[#allocation6 + $0x1d4] ss:$8 sps:$4 sm:$0xff]   ;;  %v2094_v8 = vld [vmem:[#allocation6 + $0x1d0] ss:$8 sps:$4 sm:$0xff]  }
  0x63   :  { %v140_v3 = vcombine.high %v117_v60, %v131_v61  ;;  %v2095_v10 = vld [vmem:[#allocation6 + $0xe4] ss:$8 sps:$4 sm:$0xff]   ;;  %v2099_v12 = vld [vmem:[#allocation6 + $0xe0] ss:$8 sps:$4 sm:$0xff]   ;;  %v2101_v14 = vld [vmem:[#allocation6 + $0xf4] ss:$8 sps:$4 sm:$0xff]   ;;  %v139_v17 = vcombine.low %v117_v60, %v131_v61 }
  0x64   :  { %760 = vmatpush1.bf16.msra.mxu0 %v2045_v22  ;;  %v142_v5 = vcombine.high %v124_v62, %v138_v1  ;;  %v2097_v11 = vld [vmem:[#allocation6 + $0x1e4] ss:$8 sps:$4 sm:$0xff]   ;;  %v2100_v13 = vld [vmem:[#allocation6 + $0x1e0] ss:$8 sps:$4 sm:$0xff]   ;;  %v2103_v15 = vld [vmem:[#allocation6 + $0x1f4] ss:$8 sps:$4 sm:$0xff]   ;;  %v141_v18 = vcombine.low %v124_v62, %v138_v1 }
  0x65   :  { %801 = vmatpush1.bf16.msra.mxu1 %v2046_v23  ;;  %761 = vmatprep.subr.bf16.mxu0 %v2047_v24  ;;  %v168_v6 = vpack.c.bf16 %v140_v3, %v140_v3  ;;  %v2105_v16 = vld [vmem:[#allocation6 + $0xf0] ss:$8 sps:$4 sm:$0xff]   ;;  %v2115_v20 = vld [vmem:[#allocation6 + $0x204] ss:$8 sps:$4 sm:$0xff]   ;;  %v167_v21 = vpack.c.bf16 %v139_v17, %v139_v17  ;;  %v2113_v23 = vld [vmem:[#allocation6 + $0x200] ss:$8 sps:$4 sm:$0xff]  }
  0x66   :  { %802 = vmatprep.subr.bf16.mxu1 %v2049_v25  ;;  %v170_v9 = vpack.c.bf16 %v142_v5, %v142_v5  ;;  %v2106_v19 = vld [vmem:[#allocation6 + $0x1f0] ss:$8 sps:$4 sm:$0xff]   ;;  %v169_v22 = vpack.c.bf16 %v141_v18, %v141_v18  ;;  %v2118_v24 = vld [vmem:[#allocation6 + $0x214] ss:$8 sps:$4 sm:$0xff]   ;;  %v2133_v40 = vld [vmem:[#allocation6 + $0x264] ss:$8 sps:$4 sm:$0xff]  }
  0x67   :  { %781 = vmatprep.mubr.bf16.mxu0 %v168_v6  ;;  %v2116_v25 = vld [vmem:[#allocation6 + $0x210] ss:$8 sps:$4 sm:$0xff]   ;;  %v2130_v38 = vld [vmem:[#allocation6 + $0x254] ss:$8 sps:$4 sm:$0xff]   ;;  %v2137_v45 = vld [vmem:[#allocation6 + $0x280] ss:$8 sps:$4 sm:$0xff]  }
  0x68   :  { %762 = vmatpush1.bf16.msra.mxu0 %v2051_v26  ;;  %822 = vmatprep.mubr.bf16.mxu1 %v170_v9  ;;  %v2121_v26 = vld [vmem:[#allocation6 + $0x224] ss:$8 sps:$4 sm:$0xff]   ;;  %v2128_v39 = vld [vmem:[#allocation6 + $0x250] ss:$8 sps:$4 sm:$0xff]   ;;  %v2155_v58 = vld [vmem:[#allocation6 + $0x2e0] ss:$8 sps:$4 sm:$0xff]  }
  0x69   :  { %803 = vmatpush1.bf16.msra.mxu1 %v2052_v27  ;;  %763 = vmatprep.subr.bf16.mxu0 %v2053_v28  ;;  %v2161_v27 = vld [vmem:[#allocation3 + $0x8] ss:$12 sps:$4 sm:$0xff]   ;;  %v2162_v28 = vld [vmem:[#allocation3 + $0x20] ss:$12 sps:$4 sm:$0xff]  }
  0x6a   :  { %804 = vmatprep.subr.bf16.mxu1 %v2055_v29  ;;  %v2119_v29 = vld [vmem:[#allocation6 + $0x220] ss:$8 sps:$4 sm:$0xff]   ;;  %v2152_v56 = vld [vmem:[#allocation6 + $0x2d0] ss:$8 sps:$4 sm:$0xff]   ;;  %v2157_v57 = vld [vmem:[#allocation6 + $0x2e4] ss:$8 sps:$4 sm:$0xff]  }
  0x6b   :  { %v2160_v59 = vld [vmem:[#allocation6 + $0x2f4] ss:$8 sps:$4 sm:$0xff]   ;;  %v2158_v61 = vld [vmem:[#allocation6 + $0x2f0] ss:$8 sps:$4 sm:$0xff]  }
  0x6c   :  { %764 = vmatpush1.bf16.msra.mxu0 %v2057_v30  ;;  %v151_v30 = vrot.slane %v2161_v27, %v2516_v53  ;;  %v2166_v1 = vld [vmem:[#allocation8 + $0x8] ss:$16 sps:$4 sm:$0xff]   ;;  %v2171_v3 = vld [vmem:[#allocation8 + $0x24] ss:$16 sps:$4 sm:$0xff]   ;;  %v2169_v5 = vld [vmem:[#allocation8 + $0x20] ss:$16 sps:$4 sm:$0xff]  }
  0x6d   :  { %805 = vmatpush1.bf16.msra.mxu1 %v2058_v31  ;;  %765 = vmatprep.subr.bf16.mxu0 %v2059_v32  ;;  %v158_v31 = vrot.slane %v2162_v28, %v2516_v53  ;;  %v2124_v32 = vld [vmem:[#allocation6 + $0x234] ss:$8 sps:$4 sm:$0xff]   ;;  %v2151_v53 = vld [vmem:[#allocation6 + $0x2c4] ss:$8 sps:$4 sm:$0xff]   ;;  %v2172_v6 = vld [vmem:[#allocation8 + $0x28] ss:$16 sps:$4 sm:$0xff]  }
  0x6e   :  { %806 = vmatprep.subr.bf16.mxu1 %v2061_v33  ;;  %v2175_v9 = vld [vmem:[#allocation8 + $0x40] ss:$16 sps:$4 sm:$0xff]   ;;  %v2190_v18 = vld [vmem:[#allocation8 + $0x88] ss:$16 sps:$4 sm:$0xff]   ;;  %v2207_v27 = vld [vmem:[#allocation8 + $0xe4] ss:$16 sps:$4 sm:$0xff]  }
  0x6f   :  { %v160_v33 = vcombine.high %v151_v30, %v158_v31  ;;  %v159_v60 = vcombine.low %v151_v30, %v158_v31  ;;  %v2187_v17 = vld [vmem:[#allocation8 + $0x80] ss:$16 sps:$4 sm:$0xff]   ;;  %v2210_v28 = vld [vmem:[#allocation8 + $0xec] ss:$16 sps:$4 sm:$0xff]   ;;  %v2208_v30 = vld [vmem:[#allocation8 + $0xe8] ss:$16 sps:$4 sm:$0xff]  }
  0x70   :  { %766 = vmatpush1.bf16.msra.mxu0 %v2063_v34  ;;  %v2122_v34 = vld [vmem:[#allocation6 + $0x230] ss:$8 sps:$4 sm:$0xff]   ;;  %v2213_v31 = vld [vmem:[#allocation8 + $0x104] ss:$16 sps:$4 sm:$0xff]  }
  0x71   :  { %807 = vmatpush1.bf16.msra.mxu1 %v2064_v35  ;;  %767 = vmatprep.subr.bf16.mxu0 %v2065_v36  ;;  %v172_v35 = vpack.c.bf16 %v160_v33, %v160_v33  ;;  %v2127_v36 = vld [vmem:[#allocation6 + $0x244] ss:$8 sps:$4 sm:$0xff]   ;;  %v171_v62 = vpack.c.bf16 %v159_v60, %v159_v60  ;;  %v2211_v33 = vld [vmem:[#allocation8 + $0x100] ss:$16 sps:$4 sm:$0xff]  }
  0x72   :  { %808 = vmatprep.subr.bf16.mxu1 %v2067_v37  ;;  %v2125_v37 = vld [vmem:[#allocation6 + $0x240] ss:$8 sps:$4 sm:$0xff]   ;;  %v2255_v60 = vld [vmem:[#allocation8 + $0x1e4] ss:$16 sps:$4 sm:$0xff]  }
  0x74   :  { %768 = vmatpush1.bf16.msra.mxu0 %v2069_v41  ;;  %v2131_v41 = vld [vmem:[#allocation6 + $0x260] ss:$8 sps:$4 sm:$0xff]  }
  0x75   :  { %809 = vmatpush1.bf16.msra.mxu1 %v2070_v42  ;;  %769 = vmatprep.subr.bf16.mxu0 %v2071_v43  ;;  %v2136_v42 = vld [vmem:[#allocation6 + $0x274] ss:$8 sps:$4 sm:$0xff]   ;;  %v2134_v43 = vld [vmem:[#allocation6 + $0x270] ss:$8 sps:$4 sm:$0xff]  }
  0x76   :  { %810 = vmatprep.subr.bf16.mxu1 %v2073_v44  ;;  %v2139_v44 = vld [vmem:[#allocation6 + $0x284] ss:$8 sps:$4 sm:$0xff]  }
  0x78   :  { %770 = vmatpush1.bf16.msra.mxu0 %v2075_v47  ;;  %v2142_v47 = vld [vmem:[#allocation6 + $0x294] ss:$8 sps:$4 sm:$0xff]  }
  0x79   :  { %811 = vmatpush1.bf16.msra.mxu1 %v2076_v48  ;;  %771 = vmatprep.subr.bf16.mxu0 %v2077_v49  ;;  %v2140_v48 = vld [vmem:[#allocation6 + $0x290] ss:$8 sps:$4 sm:$0xff]   ;;  %v2145_v49 = vld [vmem:[#allocation6 + $0x2a4] ss:$8 sps:$4 sm:$0xff]  }
  0x7a   :  { %812 = vmatprep.subr.bf16.mxu1 %v2079_v50  ;;  %v2143_v50 = vld [vmem:[#allocation6 + $0x2a0] ss:$8 sps:$4 sm:$0xff]  }
  0x7c   :  { %772 = vmatpush1.bf16.msra.mxu0 %v2081_v51  ;;  %v2148_v51 = vld [vmem:[#allocation6 + $0x2b4] ss:$8 sps:$4 sm:$0xff]  }
  0x7d   :  { %813 = vmatpush1.bf16.msra.mxu1 %v2082_v52  ;;  %773 = vmatprep.subr.bf16.mxu0 %v2083_v54  ;;  %v2146_v52 = vld [vmem:[#allocation6 + $0x2b0] ss:$8 sps:$4 sm:$0xff]   ;;  %v2149_v54 = vld [vmem:[#allocation6 + $0x2c0] ss:$8 sps:$4 sm:$0xff]  }
  0x7e   :  { %814 = vmatprep.subr.bf16.mxu1 %v2085_v55  ;;  %v2154_v55 = vld [vmem:[#allocation6 + $0x2d4] ss:$8 sps:$4 sm:$0xff]  }
  0x80   :  { %774 = vmatpush1.bf16.msra.mxu0 %v2087_v63  ;;  %v2163_v63 = vld [vmem:[#allocation8] ss:$16 sps:$4 sm:$0xff]  }
  0x81   :  { %815 = vmatpush1.bf16.msra.mxu1 %v2088_v0  ;;  %775 = vmatprep.subr.bf16.mxu0 %v2089_v2  ;;  %v2165_v0 = vld [vmem:[#allocation8 + $0x4] ss:$16 sps:$4 sm:$0xff]   ;;  %v2168_v2 = vld [vmem:[#allocation8 + $0xc] ss:$16 sps:$4 sm:$0xff]  }
  0x82   :  { %816 = vmatprep.subr.bf16.mxu1 %v2091_v4  ;;  %v2174_v4 = vld [vmem:[#allocation8 + $0x2c] ss:$16 sps:$4 sm:$0xff]  }
  0x84   :  { %776 = vmatpush1.bf16.msra.mxu0 %v2093_v7  ;;  %v2177_v7 = vld [vmem:[#allocation8 + $0x44] ss:$16 sps:$4 sm:$0xff]  }
  0x85   :  { %817 = vmatpush1.bf16.msra.mxu1 %v2094_v8  ;;  %777 = vmatprep.subr.bf16.mxu0 %v2095_v10  ;;  %v2180_v8 = vld [vmem:[#allocation8 + $0x4c] ss:$16 sps:$4 sm:$0xff]   ;;  %v2178_v10 = vld [vmem:[#allocation8 + $0x48] ss:$16 sps:$4 sm:$0xff]  }
  0x86   :  { %818 = vmatprep.subr.bf16.mxu1 %v2097_v11  ;;  %v2183_v11 = vld [vmem:[#allocation8 + $0x64] ss:$16 sps:$4 sm:$0xff]  }
  0x88   :  { %778 = vmatpush1.bf16.msra.mxu0 %v2099_v12  ;;  %v2186_v12 = vld [vmem:[#allocation8 + $0x6c] ss:$16 sps:$4 sm:$0xff]  }
  0x89   :  { %819 = vmatpush1.bf16.msra.mxu1 %v2100_v13  ;;  %779 = vmatprep.subr.bf16.mxu0 %v2101_v14  ;;  %v2181_v13 = vld [vmem:[#allocation8 + $0x60] ss:$16 sps:$4 sm:$0xff]   ;;  %v2184_v14 = vld [vmem:[#allocation8 + $0x68] ss:$16 sps:$4 sm:$0xff]  }
  0x8a   :  { %820 = vmatprep.subr.bf16.mxu1 %v2103_v15  ;;  %v2189_v15 = vld [vmem:[#allocation8 + $0x84] ss:$16 sps:$4 sm:$0xff]  }
  0x8c   :  { %780 = vmatpush1.bf16.msra.mxu0 %v2105_v16  ;;  %v2192_v16 = vld [vmem:[#allocation8 + $0x8c] ss:$16 sps:$4 sm:$0xff]  }
  0x8d   :  { %821 = vmatpush1.bf16.msra.mxu1 %v2106_v19  ;;  %831 = vmatprep.subr.bf16.mxu0 %v2115_v20  ;;  %v2195_v19 = vld [vmem:[#allocation8 + $0xa4] ss:$16 sps:$4 sm:$0xff]   ;;  %v2198_v20 = vld [vmem:[#allocation8 + $0xac] ss:$16 sps:$4 sm:$0xff]  }
  0x8e   :  { %1305 = vmatprep.subr.bf16.mxu1 %v2165_v0  ;;  %v2259_v0 = vld [vmem:[#allocation9 + $0x40] sm:$0xff]  }
  0x8f   :  { %782 = vmatmul.mubr.bf16.vlgmr.msra.gmra.mrb[0].mxu0 %v167_v21  ;;  %v2193_v21 = vld [vmem:[#allocation8 + $0xa0] ss:$16 sps:$4 sm:$0xff]  }
  0x90   :  { %823 = vmatmul.mubr.bf16.vlgmr.msra.gmra.mrb[0].mxu1 %v169_v22  ;;  %832 = vmatpush1.bf16.msra.mxu0 %v2113_v23  ;;  %v2196_v22 = vld [vmem:[#allocation8 + $0xa8] ss:$16 sps:$4 sm:$0xff]   ;;  %v2201_v23 = vld [vmem:[#allocation8 + $0xc4] ss:$16 sps:$4 sm:$0xff]  }
  0x91   :  { %833 = vmatprep.subr.bf16.mxu0 %v2118_v24  ;;  %863 = vmatprep.mubr.bf16.mxu0 %v172_v35  ;;  %v2204_v24 = vld [vmem:[#allocation8 + $0xcc] ss:$16 sps:$4 sm:$0xff]   ;;  %v2219_v35 = vld [vmem:[#allocation8 + $0x124] ss:$16 sps:$4 sm:$0xff]  }
  0x92   :  { %1306 = vmatpush1.bf16.msra.mxu1 %v2163_v63  ;;  %v2256_v63 = vld [vmem:[#allocation8 + $0x1e8] ss:$16 sps:$4 sm:$0xff]  }
  0x93   :  { %1307 = vmatprep.subr.bf16.mxu1 %v2171_v3 }
  0x94   :  { %834 = vmatpush1.bf16.msra.mxu0 %v2116_v25  ;;  %v2199_v25 = vld [vmem:[#allocation8 + $0xc0] ss:$16 sps:$4 sm:$0xff]  }
  0x95   :  { %835 = vmatprep.subr.bf16.mxu0 %v2121_v26  ;;  %v2202_v26 = vld [vmem:[#allocation8 + $0xc8] ss:$16 sps:$4 sm:$0xff]  }
  0x96   :  { %1308 = vmatpush1.bf16.msra.mxu1 %v2169_v5 }
  0x97   :  { %1309 = vmatprep.subr.bf16.mxu1 %v2177_v7 }
  0x98   :  { %836 = vmatpush1.bf16.msra.mxu0 %v2119_v29  ;;  %v2205_v29 = vld [vmem:[#allocation8 + $0xe0] ss:$16 sps:$4 sm:$0xff]  }
  0x99   :  { %837 = vmatprep.subr.bf16.mxu0 %v2124_v32  ;;  %v2216_v32 = vld [vmem:[#allocation8 + $0x10c] ss:$16 sps:$4 sm:$0xff]  }
  0x9a   :  { %1310 = vmatpush1.bf16.msra.mxu1 %v2175_v9 }
  0x9b   :  { %1311 = vmatprep.subr.bf16.mxu1 %v2183_v11  ;;  %v885_v11 = vsub.s32 0, %v2513_v46 }
  0x9c   :  { %838 = vmatpush1.bf16.msra.mxu0 %v2122_v34  ;;  %v2214_v34 = vld [vmem:[#allocation8 + $0x108] ss:$16 sps:$4 sm:$0xff]  }
  0x9d   :  { %839 = vmatprep.subr.bf16.mxu0 %v2127_v36  ;;  %v2222_v36 = vld [vmem:[#allocation8 + $0x12c] ss:$16 sps:$4 sm:$0xff]  }
  0x9e   :  { %1312 = vmatpush1.bf16.msra.mxu1 %v2181_v13  ;;  %v889_v13 = vsub.s32 1, %v2513_v46 }
  0x9f   :  { %1313 = vmatprep.subr.bf16.mxu1 %v2189_v15 }
  0xa0   :  { %840 = vmatpush1.bf16.msra.mxu0 %v2125_v37  ;;  %v2217_v37 = vld [vmem:[#allocation8 + $0x120] ss:$16 sps:$4 sm:$0xff]  }
  0xa1   :  { %841 = vmatprep.subr.bf16.mxu0 %v2130_v38  ;;  %v2220_v38 = vld [vmem:[#allocation8 + $0x128] ss:$16 sps:$4 sm:$0xff]  }
  0xa2   :  { %1314 = vmatpush1.bf16.msra.mxu1 %v2187_v17 }
  0xa3   :  { %1315 = vmatprep.subr.bf16.mxu1 %v2195_v19 }
  0xa4   :  { %842 = vmatpush1.bf16.msra.mxu0 %v2128_v39  ;;  %v2225_v39 = vld [vmem:[#allocation8 + $0x144] ss:$16 sps:$4 sm:$0xff]  }
  0xa5   :  { %843 = vmatprep.subr.bf16.mxu0 %v2133_v40  ;;  %v2228_v40 = vld [vmem:[#allocation8 + $0x14c] ss:$16 sps:$4 sm:$0xff]  }
  0xa6   :  { %1316 = vmatpush1.bf16.msra.mxu1 %v2193_v21 }
  0xa7   :  { %1317 = vmatprep.subr.bf16.mxu1 %v2201_v23 }
  0xa8   :  { %844 = vmatpush1.bf16.msra.mxu0 %v2131_v41  ;;  %v2223_v41 = vld [vmem:[#allocation8 + $0x140] ss:$16 sps:$4 sm:$0xff]  }
  0xa9   :  { %845 = vmatprep.subr.bf16.mxu0 %v2136_v42  ;;  %v2226_v42 = vld [vmem:[#allocation8 + $0x148] ss:$16 sps:$4 sm:$0xff]  }
  0xaa   :  { %1318 = vmatpush1.bf16.msra.mxu1 %v2199_v25 }
  0xab   :  { %1319 = vmatprep.subr.bf16.mxu1 %v2207_v27  ;;  %v2260_v27 = vld [vmem:[#allocation9] sm:$0xff]  }
  0xac   :  { %846 = vmatpush1.bf16.msra.mxu0 %v2134_v43  ;;  %v2231_v43 = vld [vmem:[#allocation8 + $0x164] ss:$16 sps:$4 sm:$0xff]  }
  0xad   :  { %847 = vmatprep.subr.bf16.mxu0 %v2139_v44  ;;  %v2234_v44 = vld [vmem:[#allocation8 + $0x16c] ss:$16 sps:$4 sm:$0xff]  }
  0xae   :  { %1320 = vmatpush1.bf16.msra.mxu1 %v2205_v29  ;;  %v2261_v29 = vld [vmem:[#allocation9 + $0x48] sm:$0xff]  }
  0xaf   :  { %1321 = vmatprep.subr.bf16.mxu1 %v2213_v31  ;;  %v2263_v31 = vld [vmem:[#allocation9 + $0x50] sm:$0xff]  }
  0xb0   :  { %848 = vmatpush1.bf16.msra.mxu0 %v2137_v45  ;;  %v2229_v45 = vld [vmem:[#allocation8 + $0x160] ss:$16 sps:$4 sm:$0xff]  }
  0xb1   :  { %849 = vmatprep.subr.bf16.mxu0 %v2142_v47  ;;  %v2232_v47 = vld [vmem:[#allocation8 + $0x168] ss:$16 sps:$4 sm:$0xff]  }
  0xb2   :  { %1322 = vmatpush1.bf16.msra.mxu1 %v2211_v33  ;;  %v2265_v33 = vld [vmem:[#allocation9 + $0x58] sm:$0xff]  }
  0xb3   :  { %1323 = vmatprep.subr.bf16.mxu1 %v2219_v35  ;;  %v2267_v35 = vld [vmem:[#allocation9 + $0x60] sm:$0xff]  }
  0xb4   :  { %850 = vmatpush1.bf16.msra.mxu0 %v2140_v48  ;;  %v2237_v48 = vld [vmem:[#allocation8 + $0x184] ss:$16 sps:$4 sm:$0xff]  }
  0xb5   :  { %851 = vmatprep.subr.bf16.mxu0 %v2145_v49  ;;  %v2240_v49 = vld [vmem:[#allocation8 + $0x18c] ss:$16 sps:$4 sm:$0xff]  }
  0xb6   :  { %1324 = vmatpush1.bf16.msra.mxu1 %v2217_v37  ;;  %v2269_v37 = vld [vmem:[#allocation9 + $0x68] sm:$0xff]  }
  0xb7   :  { %1325 = vmatprep.subr.bf16.mxu1 %v2225_v39  ;;  %v2271_v39 = vld [vmem:[#allocation9 + $0x70] sm:$0xff]  }
  0xb8   :  { %852 = vmatpush1.bf16.msra.mxu0 %v2143_v50  ;;  %v2235_v50 = vld [vmem:[#allocation8 + $0x180] ss:$16 sps:$4 sm:$0xff]  }
  0xb9   :  { %853 = vmatprep.subr.bf16.mxu0 %v2148_v51  ;;  %v2238_v51 = vld [vmem:[#allocation8 + $0x188] ss:$16 sps:$4 sm:$0xff]  }
  0xba   :  { %1326 = vmatpush1.bf16.msra.mxu1 %v2223_v41  ;;  %v2273_v41 = vld [vmem:[#allocation9 + $0x78] sm:$0xff]  }
  0xbb   :  { %1327 = vmatprep.subr.bf16.mxu1 %v2231_v43  ;;  %v2275_v43 = vld [vmem:[#allocation9 + $0xc0] sm:$0xff]  }
  0xbc   :  { %854 = vmatpush1.bf16.msra.mxu0 %v2146_v52  ;;  %v2243_v52 = vld [vmem:[#allocation8 + $0x1a4] ss:$16 sps:$4 sm:$0xff]  }
  0xbd   :  { %855 = vmatprep.subr.bf16.mxu0 %v2151_v53  ;;  %v2246_v53 = vld [vmem:[#allocation8 + $0x1ac] ss:$16 sps:$4 sm:$0xff]  }
  0xbe   :  { %1328 = vmatpush1.bf16.msra.mxu1 %v2229_v45  ;;  %v979_v45 = vsub.s32 3, %v2513_v46 }
  0xbf   :  { %1329 = vmatprep.subr.bf16.mxu1 %v2237_v48 }
  0xc0   :  { %856 = vmatpush1.bf16.msra.mxu0 %v2149_v54  ;;  %v2241_v54 = vld [vmem:[#allocation8 + $0x1a0] ss:$16 sps:$4 sm:$0xff]  }
  0xc1   :  { %857 = vmatprep.subr.bf16.mxu0 %v2154_v55  ;;  %v2244_v55 = vld [vmem:[#allocation8 + $0x1a8] ss:$16 sps:$4 sm:$0xff]  }
  0xc2   :  { %1330 = vmatpush1.bf16.msra.mxu1 %v2235_v50 }
  0xc3   :  { %1331 = vmatprep.subr.bf16.mxu1 %v2243_v52 }
  0xc4   :  { %858 = vmatpush1.bf16.msra.mxu0 %v2152_v56  ;;  %v2249_v56 = vld [vmem:[#allocation8 + $0x1c4] ss:$16 sps:$4 sm:$0xff]  }
  0xc5   :  { %859 = vmatprep.subr.bf16.mxu0 %v2157_v57  ;;  %v2252_v57 = vld [vmem:[#allocation8 + $0x1cc] ss:$16 sps:$4 sm:$0xff]  }
  0xc6   :  { %1332 = vmatpush1.bf16.msra.mxu1 %v2241_v54 }
  0xc7   :  { %1333 = vmatprep.subr.bf16.mxu1 %v2249_v56 }
  0xc8   :  { %860 = vmatpush1.bf16.msra.mxu0 %v2155_v58  ;;  %v2247_v58 = vld [vmem:[#allocation8 + $0x1c0] ss:$16 sps:$4 sm:$0xff]  }
  0xc9   :  { %861 = vmatprep.subr.bf16.mxu0 %v2160_v59  ;;  %v2250_v59 = vld [vmem:[#allocation8 + $0x1c8] ss:$16 sps:$4 sm:$0xff]  }
  0xca   :  { %1334 = vmatpush1.bf16.msra.mxu1 %v2247_v58 }
  0xcb   :  { %1335 = vmatprep.subr.bf16.mxu1 %v2255_v60 }
  0xcc   :  { %862 = vmatpush1.bf16.msra.mxu0 %v2158_v61  ;;  %v2258_v61 = vld [vmem:[#allocation8 + $0x1ec] ss:$16 sps:$4 sm:$0xff]  }
  0xcd   :  { %1346 = vmatprep.subr.bf16.mxu0 %v2168_v2 }
  0xcf   :  { %864 = vmatmul.mubr.bf16.vlgmr.msra.gmra.mrb[4].mxu0 %v171_v62  ;;  %v2253_v62 = vld [vmem:[#allocation8 + $0x1e0] ss:$16 sps:$4 sm:$0xff]  }
  0xd0   :  { %1347 = vmatpush1.bf16.msra.mxu0 %v2166_v1  ;;  %1336 = vmatpush1.bf16.msra.mxu1 %v2253_v62 }
  0xd1   :  { %1348 = vmatprep.subr.bf16.mxu0 %v2174_v4  ;;  %1951 = vmatprep.subr.bf16.mxu1 %v2259_v0 }
  0xd4   :  { %1349 = vmatpush1.bf16.msra.mxu0 %v2172_v6 }
  0xd5   :  { %1350 = vmatprep.subr.bf16.mxu0 %v2180_v8 }
  0xd8   :  { %1351 = vmatpush1.bf16.msra.mxu0 %v2178_v10 }
  0xd9   :  { %1352 = vmatprep.subr.bf16.mxu0 %v2186_v12  ;;  %v881_v12 = vld [vmem:[%s2551_s2] sm:$0x3] }
  0xdc   :  { %1353 = vmatpush1.bf16.msra.mxu0 %v2184_v14  ;;  %v886_v14 = vrot.slane %v881_v12, %v885_v11 }
  0xdd   :  { %1354 = vmatprep.subr.bf16.mxu0 %v2192_v16  ;;  %v890_v16 = vrot.slane %v881_v12, %v889_v13  ;;  %v975_v12 = vsub.s32 2, %v2513_v46 }
  0xe0   :  { %1355 = vmatpush1.bf16.msra.mxu0 %v2190_v18 }
  0xe1   :  { %1356 = vmatprep.subr.bf16.mxu0 %v2198_v20 }
  0xe4   :  { %1357 = vmatpush1.bf16.msra.mxu0 %v2196_v22 }
  0xe5   :  { %1358 = vmatprep.subr.bf16.mxu0 %v2204_v24 }
  0xe8   :  { %1359 = vmatpush1.bf16.msra.mxu0 %v2202_v26 }
  0xe9   :  { %1360 = vmatprep.subr.bf16.mxu0 %v2210_v28 }
  0xec   :  { %1361 = vmatpush1.bf16.msra.mxu0 %v2208_v30  ;;  %v2262_v30 = vld [vmem:[#allocation9 + $0x8] sm:$0xff]  }
  0xed   :  { %1362 = vmatprep.subr.bf16.mxu0 %v2216_v32  ;;  %v2264_v32 = vld [vmem:[#allocation9 + $0x10] sm:$0xff]  }
  0xf0   :  { %1363 = vmatpush1.bf16.msra.mxu0 %v2214_v34  ;;  %v2266_v34 = vld [vmem:[#allocation9 + $0x18] sm:$0xff]  }
  0xf1   :  { %1364 = vmatprep.subr.bf16.mxu0 %v2222_v36  ;;  %v2268_v36 = vld [vmem:[#allocation9 + $0x20] sm:$0xff]  }
  0xf4   :  { %1365 = vmatpush1.bf16.msra.mxu0 %v2220_v38  ;;  %v2270_v38 = vld [vmem:[#allocation9 + $0x28] sm:$0xff]  }
  0xf5   :  { %1366 = vmatprep.subr.bf16.mxu0 %v2228_v40  ;;  %v2272_v40 = vld [vmem:[#allocation9 + $0x30] sm:$0xff]  }
  0xf8   :  { %1367 = vmatpush1.bf16.msra.mxu0 %v2226_v42  ;;  %v2274_v42 = vld [vmem:[#allocation9 + $0x38] sm:$0xff]  }
  0xf9   :  { %1368 = vmatprep.subr.bf16.mxu0 %v2234_v44  ;;  %v963_v44 = vld [vmem:[%s2553_s4] sm:$0xf] }
  0xfa   :  { %v972_v48 = vrot.slane %v963_v44, %v889_v13  ;;  %v2285_v13 = vld [vmem:[#allocation9 + $0xe8] sm:$0xff]  }
  0xfc   :  { %1369 = vmatpush1.bf16.msra.mxu0 %v2232_v47  ;;  %v968_v47 = vrot.slane %v963_v44, %v885_v11  ;;  %v2284_v11 = vld [vmem:[#allocation9 + $0xa0] sm:$0xff]  }
  0xfd   :  { %1370 = vmatprep.subr.bf16.mxu0 %v2240_v49  ;;  %v980_v49 = vrot.slane %v963_v44, %v979_v45 }
 0x100   :  { %1371 = vmatpush1.bf16.msra.mxu0 %v2238_v51 }
 0x101   :  { %1372 = vmatprep.subr.bf16.mxu0 %v2246_v53 }
 0x104   :  { %1373 = vmatpush1.bf16.msra.mxu0 %v2244_v55 }
 0x105   :  { %1374 = vmatprep.subr.bf16.mxu0 %v2252_v57 }
 0x108   :  { %1375 = vmatpush1.bf16.msra.mxu0 %v2250_v59 }
 0x109   :  { %1376 = vmatprep.subr.bf16.mxu0 %v2258_v61 }
 0x10c   :  { %1377 = vmatpush1.bf16.msra.mxu0 %v2256_v63 }
 0x162   :  { %v783_v1 = vpop.f32.mrb[0].mxu0 }
 0x163   :  { %v824_v2 = vpop.f32.mrb[0].mxu1  ;;  %v785_v4 = vpop.f32.mrb[1].mxu0 }
 0x164   :  { %v825_v3 = vadd.f32 %v824_v2, %v783_v1  ;;  %v826_v5 = vpop.f32.mrb[1].mxu1  ;;  %v787_v7 = vpop.f32.mrb[2].mxu0  ;;  %v2276_v1 = vld [vmem:[#allocation9 + $0x80] sm:$0xff]  }
 0x165   :  { %v827_v6 = vadd.f32 %v826_v5, %v785_v4  ;;  %v828_v8 = vpop.f32.mrb[2].mxu1  ;;  %v788_v9 = vpop.f32.mrb[3].mxu0  ;;  %v2278_v5 = vld [vmem:[#allocation9 + $0x88] sm:$0xff]   ;;  %v2280_v7 = vld [vmem:[#allocation9 + $0x90] sm:$0xff]  }
 0x166   :  { %v829_v10 = vpop.f32.mrb[3].mxu1  ;;  %v2281_v8 = vld [vmem:[#allocation9 + $0xd8] sm:$0xff]  }
 0x167   :  { %v2282_v9 = vld [vmem:[#allocation9 + $0x98] sm:$0xff]   ;;  %v2283_v10 = vld [vmem:[#allocation9 + $0xe0] sm:$0xff]  }
 0x1a2   :  { %v865_v15 = vpop.f32.mrb[4].mxu0 }
 0x1a3   :  { %v866_v17 = vadd.f32 %v865_v15, %v825_v3  ;;  %v867_v18 = vpop.f32.mrb[5].mxu0  ;;  %v2277_v3 = vld [vmem:[#allocation9 + $0xc8] sm:$0xff]   ;;  %v976_v15 = vrot.slane %v963_v44, %v975_v12 }
 0x1a4   :  { %v868_v19 = vadd.f32 %v867_v18, %v827_v6  ;;  %v869_v20 = vpop.f32.mrb[6].mxu0  ;;  %v2279_v6 = vld [vmem:[#allocation9 + $0xd0] sm:$0xff]  }
 0x1a5   :  { %v893_v21 = vadd.f32 %v886_v14, %v866_v17  ;;  %v870_v22 = vpop.f32.mrb[7].mxu0  ;;  %v2286_v14 = vld [vmem:[#allocation9 + $0xa8] sm:$0xff]   ;;  %v2288_v17 = vld [vmem:[#allocation9 + $0xb0] sm:$0xff]   ;;  %v2290_v20 = vld [vmem:[#allocation9 + $0xb8] sm:$0xff]  }
 0x1a6   :  { %v894_v23 = vadd.f32 %v890_v16, %v868_v19  ;;  %v2287_v16 = vld [vmem:[#allocation9 + $0xf0] sm:$0xff]   ;;  %v2289_v19 = vld [vmem:[#allocation9 + $0xf8] sm:$0xff]  }
 0x1a7   :  { %v895_v24 = vmax.f32 %v893_v21, 0.0 }
 0x1a8   :  { %v896_v25 = vmax.f32 %v894_v23, 0.0 }
 0x1a9   :  { %v897_v28 = vpack.c.bf16 %v895_v24, %v895_v24 }
 0x1aa   :  { %v898_v26 = vpack.c.bf16 %v896_v25, %v896_v25 }
 0x1ac   :  { %1337 = vmatprep.mubr.bf16.mxu1 %v898_v26  ;;  %1378 = vmatprep.mubr.bf16.mxu0 %v898_v26 }
 0x1ad   :  { %1338 = vmatmul.mubr.bf16.vlgmr.msra.gmra.mrb[4].mxu1 %v897_v28  ;;  %1379 = vmatmul.mubr.bf16.vlgmr.msra.gmra.mrb[8].mxu0 %v897_v28 }
 0x1ae   :  { %1952 = vmatpush3.bf16.msra.mxu1 %v2260_v27  ;;  %v1918_v27 = vld [vmem:[%s2555_s6] ss:$0 sm:$0xff] }
 0x1af   :  { %1953 = vmatprep.subr.bf16.mxu1 %v2261_v29 }
 0x1b2   :  { %1954 = vmatpush3.bf16.msra.mxu1 %v2262_v30 }
 0x1b3   :  { %1955 = vmatprep.subr.bf16.mxu1 %v2263_v31 }
 0x1b6   :  { %1956 = vmatpush3.bf16.msra.mxu1 %v2264_v32 }
 0x1b7   :  { %1957 = vmatprep.subr.bf16.mxu1 %v2265_v33 }
 0x1ba   :  { %1958 = vmatpush3.bf16.msra.mxu1 %v2266_v34 }
 0x1bb   :  { %1959 = vmatprep.subr.bf16.mxu1 %v2267_v35 }
 0x1be   :  { %1960 = vmatpush3.bf16.msra.mxu1 %v2268_v36 }
 0x1bf   :  { %1961 = vmatprep.subr.bf16.mxu1 %v2269_v37 }
 0x1c2   :  { %1962 = vmatpush3.bf16.msra.mxu1 %v2270_v38 }
 0x1c3   :  { %1963 = vmatprep.subr.bf16.mxu1 %v2271_v39 }
 0x1c6   :  { %1964 = vmatpush3.bf16.msra.mxu1 %v2272_v40 }
 0x1c7   :  { %1965 = vmatprep.subr.bf16.mxu1 %v2273_v41 }
 0x1ca   :  { %1966 = vmatpush3.bf16.msra.mxu1 %v2274_v42 }
 0x1cb   :  { %1973 = vmatprep.subr.bf16.mxu1 %v2275_v43 }
 0x280   :  { %v1339_v50 = vpop.f32.mrb[4].mxu1  ;;  %v1380_v51 = vpop.f32.mrb[8].mxu0 }
 0x281   :  { %v1340_v52 = vadd.f32 %v1339_v50, %v968_v47  ;;  %v1341_v53 = vpop.f32.mrb[5].mxu1  ;;  %v1382_v54 = vpop.f32.mrb[9].mxu0  ;;  %v1381_v18 = vadd.f32 %v1380_v51, %v976_v15 }
 0x282   :  { %v1342_v55 = vadd.f32 %v1341_v53, %v972_v48  ;;  %v1383_v56 = vadd.f32 %v1382_v54, %v980_v49  ;;  %v1343_v57 = vpop.f32.mrb[6].mxu1  ;;  %v1384_v58 = vpop.f32.mrb[10].mxu0 }
 0x283   :  { %v1387_v59 = vmax.f32 %v1340_v52, 0.0  ;;  %v1344_v60 = vpop.f32.mrb[7].mxu1  ;;  %v1385_v61 = vpop.f32.mrb[11].mxu0  ;;  %v1389_v21 = vmax.f32 %v1381_v18, 0.0 }
 0x284   :  { %v1388_v62 = vmax.f32 %v1342_v55, 0.0  ;;  %v1390_v63 = vmax.f32 %v1383_v56, 0.0 }
 0x285   :  { %v1391_v2 = vpack.c.bf16 %v1387_v59, %v1387_v59  ;;  %v1393_v22 = vpack.c.bf16 %v1389_v21, %v1389_v21 }
 0x286   :  { %v1392_v0 = vpack.c.bf16 %v1388_v62, %v1388_v62  ;;  %v1394_v4 = vpack.c.bf16 %v1390_v63, %v1390_v63 }
 0x288   :  { %1690 = vmatprep.mubr.bf16.mxu1 %v1392_v0 }
 0x289   :  { %1691 = vmatmul.mubr.bf16.vlgmr.msra.gmra.mrb[8].mxu1 %v1391_v2 }
 0x28a   :  { %1974 = vmatpush3.bf16.msra.mxu1 %v2276_v1  ;;  %1730 = vmatprep.mubr.bf16.mxu1 %v1394_v4 }
 0x28b   :  { %1975 = vmatprep.subr.bf16.mxu1 %v2277_v3 }
 0x28e   :  { %1976 = vmatpush3.bf16.msra.mxu1 %v2278_v5 }
 0x28f   :  { %1977 = vmatprep.subr.bf16.mxu1 %v2279_v6 }
 0x292   :  { %1978 = vmatpush3.bf16.msra.mxu1 %v2280_v7 }
 0x293   :  { %1979 = vmatprep.subr.bf16.mxu1 %v2281_v8 }
 0x296   :  { %1980 = vmatpush3.bf16.msra.mxu1 %v2282_v9 }
 0x297   :  { %1981 = vmatprep.subr.bf16.mxu1 %v2283_v10 }
 0x29a   :  { %1982 = vmatpush3.bf16.msra.mxu1 %v2284_v11 }
 0x29b   :  { %1983 = vmatprep.subr.bf16.mxu1 %v2285_v13 }
 0x29e   :  { %1984 = vmatpush3.bf16.msra.mxu1 %v2286_v14 }
 0x29f   :  { %1985 = vmatprep.subr.bf16.mxu1 %v2287_v16 }
 0x2a2   :  { %1986 = vmatpush3.bf16.msra.mxu1 %v2288_v17 }
 0x2a3   :  { %1987 = vmatprep.subr.bf16.mxu1 %v2289_v19 }
 0x2a6   :  { %1988 = vmatpush3.bf16.msra.mxu1 %v2290_v20 }
 0x2a9   :  { %1731 = vmatmul.mubr.bf16.vlgmr.msra.gmra.mrb[12].mxu1 %v1393_v22 }
 0x35c   :  { %v1967_v46 = vpop.f32.mrb[8].mxu1 }
 0x35d   :  { %v1968_v23 = vpop.f32.mrb[9].mxu1 }
 0x35e   :  { %v1969_v24 = vadd.f32 %v1968_v23, %v1967_v46  ;;  %v1970_v25 = vpop.f32.mrb[10].mxu1 }
 0x35f   :  { %v1971_v26 = vpop.f32.mrb[11].mxu1 }
 0x360   :  { %v1693_v30 = vadd.f32 %v1969_v24, %v1918_v27 }
 0x37c   :  { %v1989_v28 = vpop.f32.mrb[12].mxu1 }
 0x37d   :  { %v1990_v29 = vpop.f32.mrb[13].mxu1 }
 0x37e   :  { %v1991_v31 = vadd.f32 %v1990_v29, %v1989_v28  ;;  %v1992_v32 = vpop.f32.mrb[14].mxu1 }
 0x37f   :  { %v1993_v33 = vpop.f32.mrb[15].mxu1 }
 0x380   :  { %v1733_v34 = vadd.f32 %v1991_v31, %v1693_v30 }
 0x382   :  { %1738 = vst [vmem:[#allocation11] sm:$0xff] %v1733_v34 }
 0x383   :  { %1743 = vsyncadd [#allocation5], 96  ;;  %s2422_s11 = smov [#allocation11]  }
 0x384   :  { %s1744_s12 = sshll.u32 %s2422_s11, 4  ;;  %s1745_s12 = int_to_ptr.vmem [resolvable:$true] %s1744_s12 }
 0x385   :  { %s2379_s13 = scalar_lea.vmem %s1745_s12, 32  ;;  %s2383_s14 = scalar_lea.vmem %s1745_s12, 128 }
 0x386   :  { %p2380_p4 = scmp.ne.s32.totalorder %s1745_s12, %s2379_s13  ;;  %p2384_p5 = scmp.lt.s32.totalorder %s1745_s12, %s1745_s12 }
 0x387   :  { %p2385_p6 = scmp.lt.s32.totalorder %s2383_s14, %s2379_s13 }
 0x389   :  { %p2386_p7 = por %p2385_p6, %p2384_p5 }
 0x38b   :  { %p2387_p8 = pnand %p2386_p7, %p2380_p4 }
 0x38d   :  { %2390 = shalt.err (!%p2387_p8)
}
 0x38e   :  { %s2391_s0 = scalar_lea.hbm %s2556_s7, 32 }
 0x38f   :  { %p2392_p9 = scmp.ne.s32.totalorder %s2556_s7, %s2391_s0  ;;  %p2395_p10 = scmp.lt.u32.totalorder %s2391_s0, %s2556_s7 }
 0x391   :  { %p2397_p11 = pnand %p2395_p10, %p2392_p9 }
 0x393   :  { %2400 = shalt.err (!%p2397_p11)
}
 0x394   :  { %s2423_s20 = smov 32   ;;  %s2424_s21 = smov 2  }
 0x395   :  { %1750 = dma.vmem_to_hbm [thread:$0]  %s1745_s12, 32, %s2556_s7, [#allocation5], %s2423_s20, %s2423_s20, %s2424_s21  }
 0x396   :  { %2407 = dma.done.wait [#allocation5], 128  }
 0x397   :  { %2408 = vsyncadd [#allocation5], 4294967168 }
 0x398   :  { %1754 = vsyncpa [#allocation4], 1 }
 0x399   :  { %1755 = vsyncpa [#allocation7], 1 }
 0x39a   :  { %1756 = vsyncpa [#allocation10], 1 }
 0x39b   :  { %1757 = vsyncpa [#allocation5], 1 }

// kernel: tpu_custom_call.1
= control target key start
LH: loop header
LB: loop body
LE: loop exit
PB: predicated region body
PF: predicated region fallthrough
CT: control target
= control target key end

     0   :  { %12 = vsyncpa [#allocation4], 0  ;;  %s2549_s0 = inlined_call_operand.hbm [shape: f32[2,768], index: 0, kind: input, shape index: {}]   ;;  %s2550_s1 = inlined_call_operand.hbm [shape: bf16[768,256], index: 1, kind: input, shape index: {}]   ;;  %s2551_s2 = inlined_call_operand.vmem [shape: f32[1,256], index: 2, kind: input, shape index: {}]   ;;  %s2552_s3 = inlined_call_operand.hbm [shape: bf16[256,512], index: 3, kind: input, shape index: {}]   ;;  %s2553_s4 = inlined_call_operand.vmem [shape: f32[1,512], index: 4, kind: input, shape index: {}]   ;;  %s2554_s5 = inlined_call_operand.hbm [shape: bf16[512,128], index: 5, kind: input, shape index: {}]   ;;  %s2555_s6 = inlined_call_operand.vmem [shape: f32[1,128], index: 6, kind: input, shape index: {}]   ;;  %s2556_s7 = inlined_call_operand.hbm [shape: f32[2,128], index: 7, kind: output, shape index: {}]  }
   0x1   :  { %13 = vsyncpa [#allocation7], 0 }
   0x2   :  { %14 = vsyncpa [#allocation10], 0 }
   0x3   :  { %15 = vsyncpa [#allocation5], 0 }
   0x4   :  { %20 = vsyncadd [#allocation4], 576  ;;  %s2409_s24 = smov [#allocation6]   ;;  %s2291_s28 = scalar_lea.hbm %s2550_s1, 12288 }
   0x5   :  { %s33_s25 = sshll.u32 %s2409_s24, 4  ;;  %p2292_p0 = scmp.ne.s32.totalorder %s2550_s1, %s2291_s28  ;;  %s34_s25 = int_to_ptr.vmem [resolvable:$true] %s33_s25 }
   0x6   :  { %p2295_p1 = scmp.lt.u32.totalorder %s2291_s28, %s2550_s1 }
   0x8   :  { %p2297_p2 = pnand %p2295_p1, %p2292_p0 }
   0xa   :  { %2300 = shalt.err (!%p2297_p2)
}
   0xb   :  { %s2301_s10 = scalar_lea.vmem %s34_s25, 12288  ;;  %p2306_p4 = scmp.lt.s32.totalorder %s34_s25, %s34_s25 }
   0xc   :  { %p2302_p3 = scmp.ne.s32.totalorder %s34_s25, %s2301_s10  ;;  %p2307_p5 = scmp.lt.s32.totalorder %s2301_s10, %s2301_s10 }
   0xe   :  { %p2308_p6 = por %p2307_p5, %p2306_p4 }
  0x10   :  { %p2309_p7 = pnand %p2308_p6, %p2302_p3 }
  0x12   :  { %2312 = shalt.err (!%p2309_p7)
}
  0x13   :  { %s2410_s11 = smov 128   ;;  %s2411_s12 = smov 8  }
  0x14   :  { %39 = dma.hbm_to_vmem [thread:$0]  %s2550_s1, 12288, %s34_s25, [#allocation7], %s2410_s11, %s2410_s11, %s2411_s12  }
  0x15   :  { %s2412_s15 = smov [#allocation3]   ;;  %s2313_s19 = scalar_lea.hbm %s2549_s0, 192 }
  0x16   :  { %s21_s16 = sshll.u32 %s2412_s15, 4  ;;  %p2314_p8 = scmp.ne.s32.totalorder %s2549_s0, %s2313_s19  ;;  %s22_s16 = int_to_ptr.vmem [resolvable:$true] %s21_s16 }
  0x17   :  { %p2317_p9 = scmp.lt.u32.totalorder %s2313_s19, %s2549_s0 }
  0x19   :  { %p2319_p10 = pnand %p2317_p9, %p2314_p8 }
  0x1b   :  { %2322 = shalt.err (!%p2319_p10)
}
  0x1c   :  { %s2323_s24 = scalar_lea.vmem %s22_s16, 192  ;;  %s2327_s1 = scalar_lea.vmem %s22_s16, 768 }
  0x1d   :  { %p2324_p11 = scmp.ne.s32.totalorder %s22_s16, %s2323_s24  ;;  %p2328_p12 = scmp.lt.s32.totalorder %s22_s16, %s22_s16 }
  0x1e   :  { %p2329_p13 = scmp.lt.s32.totalorder %s2327_s1, %s2323_s24 }
  0x20   :  { %p2330_p0 = por %p2329_p13, %p2328_p12 }
  0x22   :  { %p2331_p1 = pnand %p2330_p0, %p2324_p11 }
  0x24   :  { %2334 = shalt.err (!%p2331_p1)
}
  0x25   :  { %s2413_s25 = smov 192   ;;  %s2414_s26 = smov 12  }
  0x26   :  { %27 = dma.hbm_to_vmem [thread:$0]  %s2549_s0, 192, %s22_s16, [#allocation4], %s2413_s25, %s2413_s25, %s2414_s26  }
  0x27   :  { %s2415_s29 = smov [#allocation8]   ;;  %s2335_s10 = scalar_lea.hbm %s2552_s3, 8192 }
  0x28   :  { %s47_s30 = sshll.u32 %s2415_s29, 4  ;;  %p2336_p2 = scmp.ne.s32.totalorder %s2552_s3, %s2335_s10  ;;  %s48_s30 = int_to_ptr.vmem [resolvable:$true] %s47_s30 }
  0x29   :  { %p2339_p3 = scmp.lt.u32.totalorder %s2335_s10, %s2552_s3 }
  0x2b   :  { %p2341_p4 = pnand %p2339_p3, %p2336_p2 }
  0x2d   :  { %2344 = shalt.err (!%p2341_p4)
}
  0x2e   :  { %s2345_s15 = scalar_lea.vmem %s48_s30, 8192  ;;  %p2350_p6 = scmp.lt.s32.totalorder %s48_s30, %s48_s30 }
  0x2f   :  { %p2346_p5 = scmp.ne.s32.totalorder %s48_s30, %s2345_s15  ;;  %p2351_p7 = scmp.lt.s32.totalorder %s2345_s15, %s2345_s15 }
  0x31   :  { %p2352_p8 = por %p2351_p7, %p2350_p6 }
  0x33   :  { %p2353_p9 = pnand %p2352_p8, %p2346_p5 }
  0x35   :  { %2356 = shalt.err (!%p2353_p9)
}
  0x36   :  { %s2416_s0 = smov 256   ;;  %s2417_s16 = smov 16  }
  0x37   :  { %53 = dma.hbm_to_vmem [thread:$0]  %s2552_s3, 8192, %s48_s30, [#allocation7], %s2416_s0, %s2416_s0, %s2417_s16  }
  0x38   :  { %s2418_s19 = smov [#allocation9]   ;;  %s2357_s23 = scalar_lea.hbm %s2554_s5, 4096 }
  0x39   :  { %s61_s20 = sshll.u32 %s2418_s19, 4  ;;  %p2358_p10 = scmp.ne.s32.totalorder %s2554_s5, %s2357_s23  ;;  %s62_s20 = int_to_ptr.vmem [resolvable:$true] %s61_s20 }
  0x3a   :  { %p2361_p11 = scmp.lt.u32.totalorder %s2357_s23, %s2554_s5 }
  0x3c   :  { %p2363_p12 = pnand %p2361_p11, %p2358_p10 }
  0x3e   :  { %2366 = shalt.err (!%p2363_p12)
}
  0x3f   :  { %s2367_s27 = scalar_lea.vmem %s62_s20, 4096  ;;  %p2372_p0 = scmp.lt.s32.totalorder %s62_s20, %s62_s20 }
  0x40   :  { %p2368_p13 = scmp.ne.s32.totalorder %s62_s20, %s2367_s27  ;;  %p2373_p1 = scmp.lt.s32.totalorder %s2367_s27, %s2367_s27 }
  0x42   :  { %p2374_p2 = por %p2373_p1, %p2372_p0 }
  0x44   :  { %p2375_p3 = pnand %p2374_p2, %p2368_p13 }
  0x46   :  { %2378 = shalt.err (!%p2375_p3)
}
  0x47   :  { %s2419_s3 = smov 64   ;;  %s2420_s28 = smov 4  }
  0x48   :  { %67 = dma.hbm_to_vmem [thread:$0]  %s2554_s5, 4096, %s62_s20, [#allocation10], %s2419_s3, %s2419_s3, %s2420_s28  }
  0x49   :  { %2401 = dma.done.wait [#allocation4], 768  }
  0x4a   :  { %2402 = vsyncadd [#allocation4], 4294966528 }
  0x4b   :  { %2403 = dma.done.wait [#allocation7], 20480  }
  0x4c   :  { %2404 = vsyncadd [#allocation7], 4294946816 }
  0x4d   :  { %2405 = dma.done.wait [#allocation10], 4096  }
  0x4e   :  { %2406 = vsyncadd [#allocation10], 4294963200  ;;  %v2011_v0 = vld [vmem:[#allocation6 + $0x4] ss:$8 sps:$4 sm:$0xff]   ;;  %v2015_v2 = vld [vmem:[#allocation6] ss:$8 sps:$4 sm:$0xff]   ;;  %v114_v40 = vlaneseq }
  0x4f   :  { %v2013_v1 = vld [vmem:[#allocation6 + $0x104] ss:$8 sps:$4 sm:$0xff]   ;;  %749 = vmatprep.subr.bf16.mxu0 %v2011_v0  ;;  %v2016_v3 = vld [vmem:[#allocation6 + $0x100] ss:$8 sps:$4 sm:$0xff]   ;;  %v2017_v4 = vld [vmem:[#allocation6 + $0x14] ss:$8 sps:$4 sm:$0xff]  }
  0x50   :  { %790 = vmatprep.subr.bf16.mxu1 %v2013_v1  ;;  %750 = vmatpush1.bf16.msra.mxu0 %v2015_v2  ;;  %v2019_v5 = vld [vmem:[#allocation6 + $0x114] ss:$8 sps:$4 sm:$0xff]   ;;  %v2021_v6 = vld [vmem:[#allocation6 + $0x10] ss:$8 sps:$4 sm:$0xff]   ;;  %v2023_v8 = vld [vmem:[#allocation6 + $0x24] ss:$8 sps:$4 sm:$0xff]  }
  0x51   :  { %791 = vmatpush1.bf16.msra.mxu1 %v2016_v3  ;;  %751 = vmatprep.subr.bf16.mxu0 %v2017_v4  ;;  %v2022_v7 = vld [vmem:[#allocation6 + $0x110] ss:$8 sps:$4 sm:$0xff]   ;;  %v2025_v9 = vld [vmem:[#allocation6 + $0x124] ss:$8 sps:$4 sm:$0xff]   ;;  %v2027_v10 = vld [vmem:[#allocation6 + $0x20] ss:$8 sps:$4 sm:$0xff]  }
  0x52   :  { %792 = vmatprep.subr.bf16.mxu1 %v2019_v5  ;;  %v2028_v11 = vld [vmem:[#allocation6 + $0x120] ss:$8 sps:$4 sm:$0xff]   ;;  %v2029_v12 = vld [vmem:[#allocation6 + $0x34] ss:$8 sps:$4 sm:$0xff]   ;;  %v2033_v14 = vld [vmem:[#allocation6 + $0x30] ss:$8 sps:$4 sm:$0xff]  }
  0x53   :  { %v2031_v13 = vld [vmem:[#allocation6 + $0x134] ss:$8 sps:$4 sm:$0xff]   ;;  %v2034_v15 = vld [vmem:[#allocation6 + $0x130] ss:$8 sps:$4 sm:$0xff]   ;;  %v2035_v16 = vld [vmem:[#allocation6 + $0x44] ss:$8 sps:$4 sm:$0xff]  }
  0x54   :  { %752 = vmatpush1.bf16.msra.mxu0 %v2021_v6  ;;  %v2037_v17 = vld [vmem:[#allocation6 + $0x144] ss:$8 sps:$4 sm:$0xff]   ;;  %v2039_v18 = vld [vmem:[#allocation6 + $0x40] ss:$8 sps:$4 sm:$0xff]   ;;  %v2041_v20 = vld [vmem:[#allocation6 + $0x54] ss:$8 sps:$4 sm:$0xff]  }
  0x55   :  { %793 = vmatpush1.bf16.msra.mxu1 %v2022_v7  ;;  %753 = vmatprep.subr.bf16.mxu0 %v2023_v8  ;;  %v2040_v19 = vld [vmem:[#allocation6 + $0x140] ss:$8 sps:$4 sm:$0xff]   ;;  %v2043_v21 = vld [vmem:[#allocation6 + $0x154] ss:$8 sps:$4 sm:$0xff]   ;;  %v2045_v22 = vld [vmem:[#allocation6 + $0x50] ss:$8 sps:$4 sm:$0xff]  }
  0x56   :  { %794 = vmatprep.subr.bf16.mxu1 %v2025_v9  ;;  %v2046_v23 = vld [vmem:[#allocation6 + $0x150] ss:$8 sps:$4 sm:$0xff]   ;;  %v2047_v24 = vld [vmem:[#allocation6 + $0x64] ss:$8 sps:$4 sm:$0xff]   ;;  %v2051_v26 = vld [vmem:[#allocation6 + $0x60] ss:$8 sps:$4 sm:$0xff]  }
  0x57   :  { %v2049_v25 = vld [vmem:[#allocation6 + $0x164] ss:$8 sps:$4 sm:$0xff]   ;;  %v2052_v27 = vld [vmem:[#allocation6 + $0x160] ss:$8 sps:$4 sm:$0xff]   ;;  %v2053_v28 = vld [vmem:[#allocation6 + $0x74] ss:$8 sps:$4 sm:$0xff]  }
  0x58   :  { %754 = vmatpush1.bf16.msra.mxu0 %v2027_v10  ;;  %v2055_v29 = vld [vmem:[#allocation6 + $0x174] ss:$8 sps:$4 sm:$0xff]   ;;  %v2057_v30 = vld [vmem:[#allocation6 + $0x70] ss:$8 sps:$4 sm:$0xff]   ;;  %v2059_v32 = vld [vmem:[#allocation6 + $0x84] ss:$8 sps:$4 sm:$0xff]  }
  0x59   :  { %795 = vmatpush1.bf16.msra.mxu1 %v2028_v11  ;;  %755 = vmatprep.subr.bf16.mxu0 %v2029_v12  ;;  %v2058_v31 = vld [vmem:[#allocation6 + $0x170] ss:$8 sps:$4 sm:$0xff]   ;;  %v2061_v33 = vld [vmem:[#allocation6 + $0x184] ss:$8 sps:$4 sm:$0xff]   ;;  %v2063_v34 = vld [vmem:[#allocation6 + $0x80] ss:$8 sps:$4 sm:$0xff]  }
  0x5a   :  { %796 = vmatprep.subr.bf16.mxu1 %v2031_v13  ;;  %v2064_v35 = vld [vmem:[#allocation6 + $0x180] ss:$8 sps:$4 sm:$0xff]   ;;  %v2065_v36 = vld [vmem:[#allocation6 + $0x94] ss:$8 sps:$4 sm:$0xff]   ;;  %v2421_v38 = vmov 1983009808  }
  0x5b   :  { %v2067_v37 = vld [vmem:[#allocation6 + $0x194] ss:$8 sps:$4 sm:$0xff]   ;;  %v112_v39 = vunpack.c.l.s4 %v2421_v38  ;;  %v2069_v41 = vld [vmem:[#allocation6 + $0x90] ss:$8 sps:$4 sm:$0xff]   ;;  %v2071_v43 = vld [vmem:[#allocation6 + $0xa4] ss:$8 sps:$4 sm:$0xff]  }
  0x5c   :  { %756 = vmatpush1.bf16.msra.mxu0 %v2033_v14  ;;  %v2070_v42 = vld [vmem:[#allocation6 + $0x190] ss:$8 sps:$4 sm:$0xff]   ;;  %v2073_v44 = vld [vmem:[#allocation6 + $0x1a4] ss:$8 sps:$4 sm:$0xff]   ;;  %v2513_v46 = vshrl.u32 %v114_v40, 7 }
  0x5d   :  { %797 = vmatpush1.bf16.msra.mxu1 %v2034_v15  ;;  %757 = vmatprep.subr.bf16.mxu0 %v2035_v16  ;;  %v113_v45 = vunpack.c.0.s8 %v112_v39  ;;  %v2075_v47 = vld [vmem:[#allocation6 + $0xa0] ss:$8 sps:$4 sm:$0xff]   ;;  %v2077_v49 = vld [vmem:[#allocation6 + $0xb4] ss:$8 sps:$4 sm:$0xff]   ;;  %v2081_v51 = vld [vmem:[#allocation6 + $0xb0] ss:$8 sps:$4 sm:$0xff]  }
  0x5e   :  { %798 = vmatprep.subr.bf16.mxu1 %v2037_v17  ;;  %v2076_v48 = vld [vmem:[#allocation6 + $0x1a0] ss:$8 sps:$4 sm:$0xff]   ;;  %v2079_v50 = vld [vmem:[#allocation6 + $0x1b4] ss:$8 sps:$4 sm:$0xff]   ;;  %v2082_v52 = vld [vmem:[#allocation6 + $0x1b0] ss:$8 sps:$4 sm:$0xff]  }
  0x5f   :  { %v2516_v53 = vsub.s32 %v113_v45, %v2513_v46  ;;  %v2083_v54 = vld [vmem:[#allocation6 + $0xc4] ss:$8 sps:$4 sm:$0xff]   ;;  %v2107_v56 = vld [vmem:[#allocation3] ss:$12 sps:$4 sm:$0xff]   ;;  %v2109_v57 = vld [vmem:[#allocation3 + $0x18] ss:$12 sps:$4 sm:$0xff]  }
  0x60   :  { %758 = vmatpush1.bf16.msra.mxu0 %v2039_v18  ;;  %v2085_v55 = vld [vmem:[#allocation6 + $0x1c4] ss:$8 sps:$4 sm:$0xff]   ;;  %v2111_v58 = vld [vmem:[#allocation3 + $0x4] ss:$12 sps:$4 sm:$0xff]   ;;  %v2093_v7 = vld [vmem:[#allocation6 + $0xd0] ss:$8 sps:$4 sm:$0xff]  }
  0x61   :  { %799 = vmatpush1.bf16.msra.mxu1 %v2040_v19  ;;  %759 = vmatprep.subr.bf16.mxu0 %v2041_v20  ;;  %v2112_v59 = vld [vmem:[#allocation3 + $0x1c] ss:$12 sps:$4 sm:$0xff]   ;;  %v117_v60 = vrot.slane %v2107_v56, %v2516_v53  ;;  %v131_v61 = vrot.slane %v2109_v57, %v2516_v53  ;;  %v124_v62 = vrot.slane %v2111_v58, %v2516_v53  ;;  %v2087_v63 = vld [vmem:[#allocation6 + $0xc0] ss:$8 sps:$4 sm:$0xff]   ;;  %v2089_v2 = vld [vmem:[#allocation6 + $0xd4] ss:$8 sps:$4 sm:$0xff]  }
  0x62   :  { %800 = vmatprep.subr.bf16.mxu1 %v2043_v21  ;;  %v2088_v0 = vld [vmem:[#allocation6 + $0x1c0] ss:$8 sps:$4 sm:$0xff]   ;;  %v138_v1 = vrot.slane %v2112_v59, %v2516_v53  ;;  %v2091_v4 = vld [vmem:[#allocation6 + $0x1d4] ss:$8 sps:$4 sm:$0xff]   ;;  %v2094_v8 = vld [vmem:[#allocation6 + $0x1d0] ss:$8 sps:$4 sm:$0xff]  }
  0x63   :  { %v140_v3 = vcombine.high %v117_v60, %v131_v61  ;;  %v2095_v10 = vld [vmem:[#allocation6 + $0xe4] ss:$8 sps:$4 sm:$0xff]   ;;  %v2099_v12 = vld [vmem:[#allocation6 + $0xe0] ss:$8 sps:$4 sm:$0xff]   ;;  %v2101_v14 = vld [vmem:[#allocation6 + $0xf4] ss:$8 sps:$4 sm:$0xff]   ;;  %v139_v17 = vcombine.low %v117_v60, %v131_v61 }
  0x64   :  { %760 = vmatpush1.bf16.msra.mxu0 %v2045_v22  ;;  %v142_v5 = vcombine.high %v124_v62, %v138_v1  ;;  %v2097_v11 = vld [vmem:[#allocation6 + $0x1e4] ss:$8 sps:$4 sm:$0xff]   ;;  %v2100_v13 = vld [vmem:[#allocation6 + $0x1e0] ss:$8 sps:$4 sm:$0xff]   ;;  %v2103_v15 = vld [vmem:[#allocation6 + $0x1f4] ss:$8 sps:$4 sm:$0xff]   ;;  %v141_v18 = vcombine.low %v124_v62, %v138_v1 }
  0x65   :  { %801 = vmatpush1.bf16.msra.mxu1 %v2046_v23  ;;  %761 = vmatprep.subr.bf16.mxu0 %v2047_v24  ;;  %v168_v6 = vpack.c.bf16 %v140_v3, %v140_v3  ;;  %v2105_v16 = vld [vmem:[#allocation6 + $0xf0] ss:$8 sps:$4 sm:$0xff]   ;;  %v2115_v20 = vld [vmem:[#allocation6 + $0x204] ss:$8 sps:$4 sm:$0xff]   ;;  %v167_v21 = vpack.c.bf16 %v139_v17, %v139_v17  ;;  %v2113_v23 = vld [vmem:[#allocation6 + $0x200] ss:$8 sps:$4 sm:$0xff]  }
  0x66   :  { %802 = vmatprep.subr.bf16.mxu1 %v2049_v25  ;;  %v170_v9 = vpack.c.bf16 %v142_v5, %v142_v5  ;;  %v2106_v19 = vld [vmem:[#allocation6 + $0x1f0] ss:$8 sps:$4 sm:$0xff]   ;;  %v169_v22 = vpack.c.bf16 %v141_v18, %v141_v18  ;;  %v2118_v24 = vld [vmem:[#allocation6 + $0x214] ss:$8 sps:$4 sm:$0xff]   ;;  %v2133_v40 = vld [vmem:[#allocation6 + $0x264] ss:$8 sps:$4 sm:$0xff]  }
  0x67   :  { %781 = vmatprep.mubr.bf16.mxu0 %v168_v6  ;;  %v2116_v25 = vld [vmem:[#allocation6 + $0x210] ss:$8 sps:$4 sm:$0xff]   ;;  %v2130_v38 = vld [vmem:[#allocation6 + $0x254] ss:$8 sps:$4 sm:$0xff]   ;;  %v2137_v45 = vld [vmem:[#allocation6 + $0x280] ss:$8 sps:$4 sm:$0xff]  }
  0x68   :  { %762 = vmatpush1.bf16.msra.mxu0 %v2051_v26  ;;  %822 = vmatprep.mubr.bf16.mxu1 %v170_v9  ;;  %v2121_v26 = vld [vmem:[#allocation6 + $0x224] ss:$8 sps:$4 sm:$0xff]   ;;  %v2128_v39 = vld [vmem:[#allocation6 + $0x250] ss:$8 sps:$4 sm:$0xff]   ;;  %v2155_v58 = vld [vmem:[#allocation6 + $0x2e0] ss:$8 sps:$4 sm:$0xff]  }
  0x69   :  { %803 = vmatpush1.bf16.msra.mxu1 %v2052_v27  ;;  %763 = vmatprep.subr.bf16.mxu0 %v2053_v28  ;;  %v2161_v27 = vld [vmem:[#allocation3 + $0x8] ss:$12 sps:$4 sm:$0xff]   ;;  %v2162_v28 = vld [vmem:[#allocation3 + $0x20] ss:$12 sps:$4 sm:$0xff]  }
  0x6a   :  { %804 = vmatprep.subr.bf16.mxu1 %v2055_v29  ;;  %v2119_v29 = vld [vmem:[#allocation6 + $0x220] ss:$8 sps:$4 sm:$0xff]   ;;  %v2152_v56 = vld [vmem:[#allocation6 + $0x2d0] ss:$8 sps:$4 sm:$0xff]   ;;  %v2157_v57 = vld [vmem:[#allocation6 + $0x2e4] ss:$8 sps:$4 sm:$0xff]  }
  0x6b   :  { %v2160_v59 = vld [vmem:[#allocation6 + $0x2f4] ss:$8 sps:$4 sm:$0xff]   ;;  %v2158_v61 = vld [vmem:[#allocation6 + $0x2f0] ss:$8 sps:$4 sm:$0xff]  }
  0x6c   :  { %764 = vmatpush1.bf16.msra.mxu0 %v2057_v30  ;;  %v151_v30 = vrot.slane %v2161_v27, %v2516_v53  ;;  %v2166_v1 = vld [vmem:[#allocation8 + $0x8] ss:$16 sps:$4 sm:$0xff]   ;;  %v2171_v3 = vld [vmem:[#allocation8 + $0x24] ss:$16 sps:$4 sm:$0xff]   ;;  %v2169_v5 = vld [vmem:[#allocation8 + $0x20] ss:$16 sps:$4 sm:$0xff]  }
  0x6d   :  { %805 = vmatpush1.bf16.msra.mxu1 %v2058_v31  ;;  %765 = vmatprep.subr.bf16.mxu0 %v2059_v32  ;;  %v158_v31 = vrot.slane %v2162_v28, %v2516_v53  ;;  %v2124_v32 = vld [vmem:[#allocation6 + $0x234] ss:$8 sps:$4 sm:$0xff]   ;;  %v2151_v53 = vld [vmem:[#allocation6 + $0x2c4] ss:$8 sps:$4 sm:$0xff]   ;;  %v2172_v6 = vld [vmem:[#allocation8 + $0x28] ss:$16 sps:$4 sm:$0xff]  }
  0x6e   :  { %806 = vmatprep.subr.bf16.mxu1 %v2061_v33  ;;  %v2175_v9 = vld [vmem:[#allocation8 + $0x40] ss:$16 sps:$4 sm:$0xff]   ;;  %v2190_v18 = vld [vmem:[#allocation8 + $0x88] ss:$16 sps:$4 sm:$0xff]   ;;  %v2207_v27 = vld [vmem:[#allocation8 + $0xe4] ss:$16 sps:$4 sm:$0xff]  }
  0x6f   :  { %v160_v33 = vcombine.high %v151_v30, %v158_v31  ;;  %v159_v60 = vcombine.low %v151_v30, %v158_v31  ;;  %v2187_v17 = vld [vmem:[#allocation8 + $0x80] ss:$16 sps:$4 sm:$0xff]   ;;  %v2210_v28 = vld [vmem:[#allocation8 + $0xec] ss:$16 sps:$4 sm:$0xff]   ;;  %v2208_v30 = vld [vmem:[#allocation8 + $0xe8] ss:$16 sps:$4 sm:$0xff]  }
  0x70   :  { %766 = vmatpush1.bf16.msra.mxu0 %v2063_v34  ;;  %v2122_v34 = vld [vmem:[#allocation6 + $0x230] ss:$8 sps:$4 sm:$0xff]   ;;  %v2213_v31 = vld [vmem:[#allocation8 + $0x104] ss:$16 sps:$4 sm:$0xff]  }
  0x71   :  { %807 = vmatpush1.bf16.msra.mxu1 %v2064_v35  ;;  %767 = vmatprep.subr.bf16.mxu0 %v2065_v36  ;;  %v172_v35 = vpack.c.bf16 %v160_v33, %v160_v33  ;;  %v2127_v36 = vld [vmem:[#allocation6 + $0x244] ss:$8 sps:$4 sm:$0xff]   ;;  %v171_v62 = vpack.c.bf16 %v159_v60, %v159_v60  ;;  %v2211_v33 = vld [vmem:[#allocation8 + $0x100] ss:$16 sps:$4 sm:$0xff]  }
  0x72   :  { %808 = vmatprep.subr.bf16.mxu1 %v2067_v37  ;;  %v2125_v37 = vld [vmem:[#allocation6 + $0x240] ss:$8 sps:$4 sm:$0xff]   ;;  %v2255_v60 = vld [vmem:[#allocation8 + $0x1e4] ss:$16 sps:$4 sm:$0xff]  }
  0x74   :  { %768 = vmatpush1.bf16.msra.mxu0 %v2069_v41  ;;  %v2131_v41 = vld [vmem:[#allocation6 + $0x260] ss:$8 sps:$4 sm:$0xff]  }
  0x75   :  { %809 = vmatpush1.bf16.msra.mxu1 %v2070_v42  ;;  %769 = vmatprep.subr.bf16.mxu0 %v2071_v43  ;;  %v2136_v42 = vld [vmem:[#allocation6 + $0x274] ss:$8 sps:$4 sm:$0xff]   ;;  %v2134_v43 = vld [vmem:[#allocation6 + $0x270] ss:$8 sps:$4 sm:$0xff]  }
  0x76   :  { %810 = vmatprep.subr.bf16.mxu1 %v2073_v44  ;;  %v2139_v44 = vld [vmem:[#allocation6 + $0x284] ss:$8 sps:$4 sm:$0xff]  }
  0x78   :  { %770 = vmatpush1.bf16.msra.mxu0 %v2075_v47  ;;  %v2142_v47 = vld [vmem:[#allocation6 + $0x294] ss:$8 sps:$4 sm:$0xff]  }
  0x79   :  { %811 = vmatpush1.bf16.msra.mxu1 %v2076_v48  ;;  %771 = vmatprep.subr.bf16.mxu0 %v2077_v49  ;;  %v2140_v48 = vld [vmem:[#allocation6 + $0x290] ss:$8 sps:$4 sm:$0xff]   ;;  %v2145_v49 = vld [vmem:[#allocation6 + $0x2a4] ss:$8 sps:$4 sm:$0xff]  }
  0x7a   :  { %812 = vmatprep.subr.bf16.mxu1 %v2079_v50  ;;  %v2143_v50 = vld [vmem:[#allocation6 + $0x2a0] ss:$8 sps:$4 sm:$0xff]  }
  0x7c   :  { %772 = vmatpush1.bf16.msra.mxu0 %v2081_v51  ;;  %v2148_v51 = vld [vmem:[#allocation6 + $0x2b4] ss:$8 sps:$4 sm:$0xff]  }
  0x7d   :  { %813 = vmatpush1.bf16.msra.mxu1 %v2082_v52  ;;  %773 = vmatprep.subr.bf16.mxu0 %v2083_v54  ;;  %v2146_v52 = vld [vmem:[#allocation6 + $0x2b0] ss:$8 sps:$4 sm:$0xff]   ;;  %v2149_v54 = vld [vmem:[#allocation6 + $0x2c0] ss:$8 sps:$4 sm:$0xff]  }
  0x7e   :  { %814 = vmatprep.subr.bf16.mxu1 %v2085_v55  ;;  %v2154_v55 = vld [vmem:[#allocation6 + $0x2d4] ss:$8 sps:$4 sm:$0xff]  }
  0x80   :  { %774 = vmatpush1.bf16.msra.mxu0 %v2087_v63  ;;  %v2163_v63 = vld [vmem:[#allocation8] ss:$16 sps:$4 sm:$0xff]  }
  0x81   :  { %815 = vmatpush1.bf16.msra.mxu1 %v2088_v0  ;;  %775 = vmatprep.subr.bf16.mxu0 %v2089_v2  ;;  %v2165_v0 = vld [vmem:[#allocation8 + $0x4] ss:$16 sps:$4 sm:$0xff]   ;;  %v2168_v2 = vld [vmem:[#allocation8 + $0xc] ss:$16 sps:$4 sm:$0xff]  }
  0x82   :  { %816 = vmatprep.subr.bf16.mxu1 %v2091_v4  ;;  %v2174_v4 = vld [vmem:[#allocation8 + $0x2c] ss:$16 sps:$4 sm:$0xff]  }
  0x84   :  { %776 = vmatpush1.bf16.msra.mxu0 %v2093_v7  ;;  %v2177_v7 = vld [vmem:[#allocation8 + $0x44] ss:$16 sps:$4 sm:$0xff]  }
  0x85   :  { %817 = vmatpush1.bf16.msra.mxu1 %v2094_v8  ;;  %777 = vmatprep.subr.bf16.mxu0 %v2095_v10  ;;  %v2180_v8 = vld [vmem:[#allocation8 + $0x4c] ss:$16 sps:$4 sm:$0xff]   ;;  %v2178_v10 = vld [vmem:[#allocation8 + $0x48] ss:$16 sps:$4 sm:$0xff]  }
  0x86   :  { %818 = vmatprep.subr.bf16.mxu1 %v2097_v11  ;;  %v2183_v11 = vld [vmem:[#allocation8 + $0x64] ss:$16 sps:$4 sm:$0xff]  }
  0x88   :  { %778 = vmatpush1.bf16.msra.mxu0 %v2099_v12  ;;  %v2186_v12 = vld [vmem:[#allocation8 + $0x6c] ss:$16 sps:$4 sm:$0xff]  }
  0x89   :  { %819 = vmatpush1.bf16.msra.mxu1 %v2100_v13  ;;  %779 = vmatprep.subr.bf16.mxu0 %v2101_v14  ;;  %v2181_v13 = vld [vmem:[#allocation8 + $0x60] ss:$16 sps:$4 sm:$0xff]   ;;  %v2184_v14 = vld [vmem:[#allocation8 + $0x68] ss:$16 sps:$4 sm:$0xff]  }
  0x8a   :  { %820 = vmatprep.subr.bf16.mxu1 %v2103_v15  ;;  %v2189_v15 = vld [vmem:[#allocation8 + $0x84] ss:$16 sps:$4 sm:$0xff]  }
  0x8c   :  { %780 = vmatpush1.bf16.msra.mxu0 %v2105_v16  ;;  %v2192_v16 = vld [vmem:[#allocation8 + $0x8c] ss:$16 sps:$4 sm:$0xff]  }
  0x8d   :  { %821 = vmatpush1.bf16.msra.mxu1 %v2106_v19  ;;  %831 = vmatprep.subr.bf16.mxu0 %v2115_v20  ;;  %v2195_v19 = vld [vmem:[#allocation8 + $0xa4] ss:$16 sps:$4 sm:$0xff]   ;;  %v2198_v20 = vld [vmem:[#allocation8 + $0xac] ss:$16 sps:$4 sm:$0xff]  }
  0x8e   :  { %1305 = vmatprep.subr.bf16.mxu1 %v2165_v0  ;;  %v2259_v0 = vld [vmem:[#allocation9 + $0x40] sm:$0xff]  }
  0x8f   :  { %782 = vmatmul.mubr.bf16.vlgmr.msra.gmra.mrb[0].mxu0 %v167_v21  ;;  %v2193_v21 = vld [vmem:[#allocation8 + $0xa0] ss:$16 sps:$4 sm:$0xff]  }
  0x90   :  { %823 = vmatmul.mubr.bf16.vlgmr.msra.gmra.mrb[0].mxu1 %v169_v22  ;;  %832 = vmatpush1.bf16.msra.mxu0 %v2113_v23  ;;  %v2196_v22 = vld [vmem:[#allocation8 + $0xa8] ss:$16 sps:$4 sm:$0xff]   ;;  %v2201_v23 = vld [vmem:[#allocation8 + $0xc4] ss:$16 sps:$4 sm:$0xff]  }
  0x91   :  { %833 = vmatprep.subr.bf16.mxu0 %v2118_v24  ;;  %863 = vmatprep.mubr.bf16.mxu0 %v172_v35  ;;  %v2204_v24 = vld [vmem:[#allocation8 + $0xcc] ss:$16 sps:$4 sm:$0xff]   ;;  %v2219_v35 = vld [vmem:[#allocation8 + $0x124] ss:$16 sps:$4 sm:$0xff]  }
  0x92   :  { %1306 = vmatpush1.bf16.msra.mxu1 %v2163_v63  ;;  %v2256_v63 = vld [vmem:[#allocation8 + $0x1e8] ss:$16 sps:$4 sm:$0xff]  }
  0x93   :  { %1307 = vmatprep.subr.bf16.mxu1 %v2171_v3 }
  0x94   :  { %834 = vmatpush1.bf16.msra.mxu0 %v2116_v25  ;;  %v2199_v25 = vld [vmem:[#allocation8 + $0xc0] ss:$16 sps:$4 sm:$0xff]  }
  0x95   :  { %835 = vmatprep.subr.bf16.mxu0 %v2121_v26  ;;  %v2202_v26 = vld [vmem:[#allocation8 + $0xc8] ss:$16 sps:$4 sm:$0xff]  }
  0x96   :  { %1308 = vmatpush1.bf16.msra.mxu1 %v2169_v5 }
  0x97   :  { %1309 = vmatprep.subr.bf16.mxu1 %v2177_v7 }
  0x98   :  { %836 = vmatpush1.bf16.msra.mxu0 %v2119_v29  ;;  %v2205_v29 = vld [vmem:[#allocation8 + $0xe0] ss:$16 sps:$4 sm:$0xff]  }
  0x99   :  { %837 = vmatprep.subr.bf16.mxu0 %v2124_v32  ;;  %v2216_v32 = vld [vmem:[#allocation8 + $0x10c] ss:$16 sps:$4 sm:$0xff]  }
  0x9a   :  { %1310 = vmatpush1.bf16.msra.mxu1 %v2175_v9 }
  0x9b   :  { %1311 = vmatprep.subr.bf16.mxu1 %v2183_v11  ;;  %v885_v11 = vsub.s32 0, %v2513_v46 }
  0x9c   :  { %838 = vmatpush1.bf16.msra.mxu0 %v2122_v34  ;;  %v2214_v34 = vld [vmem:[#allocation8 + $0x108] ss:$16 sps:$4 sm:$0xff]  }
  0x9d   :  { %839 = vmatprep.subr.bf16.mxu0 %v2127_v36  ;;  %v2222_v36 = vld [vmem:[#allocation8 + $0x12c] ss:$16 sps:$4 sm:$0xff]  }
  0x9e   :  { %1312 = vmatpush1.bf16.msra.mxu1 %v2181_v13  ;;  %v889_v13 = vsub.s32 1, %v2513_v46 }
  0x9f   :  { %1313 = vmatprep.subr.bf16.mxu1 %v2189_v15 }
  0xa0   :  { %840 = vmatpush1.bf16.msra.mxu0 %v2125_v37  ;;  %v2217_v37 = vld [vmem:[#allocation8 + $0x120] ss:$16 sps:$4 sm:$0xff]  }
  0xa1   :  { %841 = vmatprep.subr.bf16.mxu0 %v2130_v38  ;;  %v2220_v38 = vld [vmem:[#allocation8 + $0x128] ss:$16 sps:$4 sm:$0xff]  }
  0xa2   :  { %1314 = vmatpush1.bf16.msra.mxu1 %v2187_v17 }
  0xa3   :  { %1315 = vmatprep.subr.bf16.mxu1 %v2195_v19 }
  0xa4   :  { %842 = vmatpush1.bf16.msra.mxu0 %v2128_v39  ;;  %v2225_v39 = vld [vmem:[#allocation8 + $0x144] ss:$16 sps:$4 sm:$0xff]  }
  0xa5   :  { %843 = vmatprep.subr.bf16.mxu0 %v2133_v40  ;;  %v2228_v40 = vld [vmem:[#allocation8 + $0x14c] ss:$16 sps:$4 sm:$0xff]  }
  0xa6   :  { %1316 = vmatpush1.bf16.msra.mxu1 %v2193_v21 }
  0xa7   :  { %1317 = vmatprep.subr.bf16.mxu1 %v2201_v23 }
  0xa8   :  { %844 = vmatpush1.bf16.msra.mxu0 %v2131_v41  ;;  %v2223_v41 = vld [vmem:[#allocation8 + $0x140] ss:$16 sps:$4 sm:$0xff]  }
  0xa9   :  { %845 = vmatprep.subr.bf16.mxu0 %v2136_v42  ;;  %v2226_v42 = vld [vmem:[#allocation8 + $0x148] ss:$16 sps:$4 sm:$0xff]  }
  0xaa   :  { %1318 = vmatpush1.bf16.msra.mxu1 %v2199_v25 }
  0xab   :  { %1319 = vmatprep.subr.bf16.mxu1 %v2207_v27  ;;  %v2260_v27 = vld [vmem:[#allocation9] sm:$0xff]  }
  0xac   :  { %846 = vmatpush1.bf16.msra.mxu0 %v2134_v43  ;;  %v2231_v43 = vld [vmem:[#allocation8 + $0x164] ss:$16 sps:$4 sm:$0xff]  }
  0xad   :  { %847 = vmatprep.subr.bf16.mxu0 %v2139_v44  ;;  %v2234_v44 = vld [vmem:[#allocation8 + $0x16c] ss:$16 sps:$4 sm:$0xff]  }
  0xae   :  { %1320 = vmatpush1.bf16.msra.mxu1 %v2205_v29  ;;  %v2261_v29 = vld [vmem:[#allocation9 + $0x48] sm:$0xff]  }
  0xaf   :  { %1321 = vmatprep.subr.bf16.mxu1 %v2213_v31  ;;  %v2263_v31 = vld [vmem:[#allocation9 + $0x50] sm:$0xff]  }
  0xb0   :  { %848 = vmatpush1.bf16.msra.mxu0 %v2137_v45  ;;  %v2229_v45 = vld [vmem:[#allocation8 + $0x160] ss:$16 sps:$4 sm:$0xff]  }
  0xb1   :  { %849 = vmatprep.subr.bf16.mxu0 %v2142_v47  ;;  %v2232_v47 = vld [vmem:[#allocation8 + $0x168] ss:$16 sps:$4 sm:$0xff]  }
  0xb2   :  { %1322 = vmatpush1.bf16.msra.mxu1 %v2211_v33  ;;  %v2265_v33 = vld [vmem:[#allocation9 + $0x58] sm:$0xff]  }
  0xb3   :  { %1323 = vmatprep.subr.bf16.mxu1 %v2219_v35  ;;  %v2267_v35 = vld [vmem:[#allocation9 + $0x60] sm:$0xff]  }
  0xb4   :  { %850 = vmatpush1.bf16.msra.mxu0 %v2140_v48  ;;  %v2237_v48 = vld [vmem:[#allocation8 + $0x184] ss:$16 sps:$4 sm:$0xff]  }
  0xb5   :  { %851 = vmatprep.subr.bf16.mxu0 %v2145_v49  ;;  %v2240_v49 = vld [vmem:[#allocation8 + $0x18c] ss:$16 sps:$4 sm:$0xff]  }
  0xb6   :  { %1324 = vmatpush1.bf16.msra.mxu1 %v2217_v37  ;;  %v2269_v37 = vld [vmem:[#allocation9 + $0x68] sm:$0xff]  }
  0xb7   :  { %1325 = vmatprep.subr.bf16.mxu1 %v2225_v39  ;;  %v2271_v39 = vld [vmem:[#allocation9 + $0x70] sm:$0xff]  }
  0xb8   :  { %852 = vmatpush1.bf16.msra.mxu0 %v2143_v50  ;;  %v2235_v50 = vld [vmem:[#allocation8 + $0x180] ss:$16 sps:$4 sm:$0xff]  }
  0xb9   :  { %853 = vmatprep.subr.bf16.mxu0 %v2148_v51  ;;  %v2238_v51 = vld [vmem:[#allocation8 + $0x188] ss:$16 sps:$4 sm:$0xff]  }
  0xba   :  { %1326 = vmatpush1.bf16.msra.mxu1 %v2223_v41  ;;  %v2273_v41 = vld [vmem:[#allocation9 + $0x78] sm:$0xff]  }
  0xbb   :  { %1327 = vmatprep.subr.bf16.mxu1 %v2231_v43  ;;  %v2275_v43 = vld [vmem:[#allocation9 + $0xc0] sm:$0xff]  }
  0xbc   :  { %854 = vmatpush1.bf16.msra.mxu0 %v2146_v52  ;;  %v2243_v52 = vld [vmem:[#allocation8 + $0x1a4] ss:$16 sps:$4 sm:$0xff]  }
  0xbd   :  { %855 = vmatprep.subr.bf16.mxu0 %v2151_v53  ;;  %v2246_v53 = vld [vmem:[#allocation8 + $0x1ac] ss:$16 sps:$4 sm:$0xff]  }
  0xbe   :  { %1328 = vmatpush1.bf16.msra.mxu1 %v2229_v45  ;;  %v979_v45 = vsub.s32 3, %v2513_v46 }
  0xbf   :  { %1329 = vmatprep.subr.bf16.mxu1 %v2237_v48 }
  0xc0   :  { %856 = vmatpush1.bf16.msra.mxu0 %v2149_v54  ;;  %v2241_v54 = vld [vmem:[#allocation8 + $0x1a0] ss:$16 sps:$4 sm:$0xff]  }
  0xc1   :  { %857 = vmatprep.subr.bf16.mxu0 %v2154_v55  ;;  %v2244_v55 = vld [vmem:[#allocation8 + $0x1a8] ss:$16 sps:$4 sm:$0xff]  }
  0xc2   :  { %1330 = vmatpush1.bf16.msra.mxu1 %v2235_v50 }
  0xc3   :  { %1331 = vmatprep.subr.bf16.mxu1 %v2243_v52 }
  0xc4   :  { %858 = vmatpush1.bf16.msra.mxu0 %v2152_v56  ;;  %v2249_v56 = vld [vmem:[#allocation8 + $0x1c4] ss:$16 sps:$4 sm:$0xff]  }
  0xc5   :  { %859 = vmatprep.subr.bf16.mxu0 %v2157_v57  ;;  %v2252_v57 = vld [vmem:[#allocation8 + $0x1cc] ss:$16 sps:$4 sm:$0xff]  }
  0xc6   :  { %1332 = vmatpush1.bf16.msra.mxu1 %v2241_v54 }
  0xc7   :  { %1333 = vmatprep.subr.bf16.mxu1 %v2249_v56 }
  0xc8   :  { %860 = vmatpush1.bf16.msra.mxu0 %v2155_v58  ;;  %v2247_v58 = vld [vmem:[#allocation8 + $0x1c0] ss:$16 sps:$4 sm:$0xff]  }
  0xc9   :  { %861 = vmatprep.subr.bf16.mxu0 %v2160_v59  ;;  %v2250_v59 = vld [vmem:[#allocation8 + $0x1c8] ss:$16 sps:$4 sm:$0xff]  }
  0xca   :  { %1334 = vmatpush1.bf16.msra.mxu1 %v2247_v58 }
  0xcb   :  { %1335 = vmatprep.subr.bf16.mxu1 %v2255_v60 }
  0xcc   :  { %862 = vmatpush1.bf16.msra.mxu0 %v2158_v61  ;;  %v2258_v61 = vld [vmem:[#allocation8 + $0x1ec] ss:$16 sps:$4 sm:$0xff]  }
  0xcd   :  { %1346 = vmatprep.subr.bf16.mxu0 %v2168_v2 }
  0xcf   :  { %864 = vmatmul.mubr.bf16.vlgmr.msra.gmra.mrb[4].mxu0 %v171_v62  ;;  %v2253_v62 = vld [vmem:[#allocation8 + $0x1e0] ss:$16 sps:$4 sm:$0xff]  }
  0xd0   :  { %1347 = vmatpush1.bf16.msra.mxu0 %v2166_v1  ;;  %1336 = vmatpush1.bf16.msra.mxu1 %v2253_v62 }
  0xd1   :  { %1348 = vmatprep.subr.bf16.mxu0 %v2174_v4  ;;  %1951 = vmatprep.subr.bf16.mxu1 %v2259_v0 }
  0xd4   :  { %1349 = vmatpush1.bf16.msra.mxu0 %v2172_v6 }
  0xd5   :  { %1350 = vmatprep.subr.bf16.mxu0 %v2180_v8 }
  0xd8   :  { %1351 = vmatpush1.bf16.msra.mxu0 %v2178_v10 }
  0xd9   :  { %1352 = vmatprep.subr.bf16.mxu0 %v2186_v12  ;;  %v881_v12 = vld [vmem:[%s2551_s2] sm:$0x3] }
  0xdc   :  { %1353 = vmatpush1.bf16.msra.mxu0 %v2184_v14  ;;  %v886_v14 = vrot.slane %v881_v12, %v885_v11 }
  0xdd   :  { %1354 = vmatprep.subr.bf16.mxu0 %v2192_v16  ;;  %v890_v16 = vrot.slane %v881_v12, %v889_v13  ;;  %v975_v12 = vsub.s32 2, %v2513_v46 }
  0xe0   :  { %1355 = vmatpush1.bf16.msra.mxu0 %v2190_v18 }
  0xe1   :  { %1356 = vmatprep.subr.bf16.mxu0 %v2198_v20 }
  0xe4   :  { %1357 = vmatpush1.bf16.msra.mxu0 %v2196_v22 }
  0xe5   :  { %1358 = vmatprep.subr.bf16.mxu0 %v2204_v24 }
  0xe8   :  { %1359 = vmatpush1.bf16.msra.mxu0 %v2202_v26 }
  0xe9   :  { %1360 = vmatprep.subr.bf16.mxu0 %v2210_v28 }
  0xec   :  { %1361 = vmatpush1.bf16.msra.mxu0 %v2208_v30  ;;  %v2262_v30 = vld [vmem:[#allocation9 + $0x8] sm:$0xff]  }
  0xed   :  { %1362 = vmatprep.subr.bf16.mxu0 %v2216_v32  ;;  %v2264_v32 = vld [vmem:[#allocation9 + $0x10] sm:$0xff]  }
  0xf0   :  { %1363 = vmatpush1.bf16.msra.mxu0 %v2214_v34  ;;  %v2266_v34 = vld [vmem:[#allocation9 + $0x18] sm:$0xff]  }
  0xf1   :  { %1364 = vmatprep.subr.bf16.mxu0 %v2222_v36  ;;  %v2268_v36 = vld [vmem:[#allocation9 + $0x20] sm:$0xff]  }
  0xf4   :  { %1365 = vmatpush1.bf16.msra.mxu0 %v2220_v38  ;;  %v2270_v38 = vld [vmem:[#allocation9 + $0x28] sm:$0xff]  }
  0xf5   :  { %1366 = vmatprep.subr.bf16.mxu0 %v2228_v40  ;;  %v2272_v40 = vld [vmem:[#allocation9 + $0x30] sm:$0xff]  }
  0xf8   :  { %1367 = vmatpush1.bf16.msra.mxu0 %v2226_v42  ;;  %v2274_v42 = vld [vmem:[#allocation9 + $0x38] sm:$0xff]  }
  0xf9   :  { %1368 = vmatprep.subr.bf16.mxu0 %v2234_v44  ;;  %v963_v44 = vld [vmem:[%s2553_s4] sm:$0xf] }
  0xfa   :  { %v972_v48 = vrot.slane %v963_v44, %v889_v13  ;;  %v2285_v13 = vld [vmem:[#allocation9 + $0xe8] sm:$0xff]  }
  0xfc   :  { %1369 = vmatpush1.bf16.msra.mxu0 %v2232_v47  ;;  %v968_v47 = vrot.slane %v963_v44, %v885_v11  ;;  %v2284_v11 = vld [vmem:[#allocation9 + $0xa0] sm:$0xff]  }
  0xfd   :  { %1370 = vmatprep.subr.bf16.mxu0 %v2240_v49  ;;  %v980_v49 = vrot.slane %v963_v44, %v979_v45 }
 0x100   :  { %1371 = vmatpush1.bf16.msra.mxu0 %v2238_v51 }
 0x101   :  { %1372 = vmatprep.subr.bf16.mxu0 %v2246_v53 }
 0x104   :  { %1373 = vmatpush1.bf16.msra.mxu0 %v2244_v55 }
 0x105   :  { %1374 = vmatprep.subr.bf16.mxu0 %v2252_v57 }
 0x108   :  { %1375 = vmatpush1.bf16.msra.mxu0 %v2250_v59 }
 0x109   :  { %1376 = vmatprep.subr.bf16.mxu0 %v2258_v61 }
 0x10c   :  { %1377 = vmatpush1.bf16.msra.mxu0 %v2256_v63 }
 0x162   :  { %v783_v1 = vpop.f32.mrb[0].mxu0 }
 0x163   :  { %v824_v2 = vpop.f32.mrb[0].mxu1  ;;  %v785_v4 = vpop.f32.mrb[1].mxu0 }
 0x164   :  { %v825_v3 = vadd.f32 %v824_v2, %v783_v1  ;;  %v826_v5 = vpop.f32.mrb[1].mxu1  ;;  %v787_v7 = vpop.f32.mrb[2].mxu0  ;;  %v2276_v1 = vld [vmem:[#allocation9 + $0x80] sm:$0xff]  }
 0x165   :  { %v827_v6 = vadd.f32 %v826_v5, %v785_v4  ;;  %v828_v8 = vpop.f32.mrb[2].mxu1  ;;  %v788_v9 = vpop.f32.mrb[3].mxu0  ;;  %v2278_v5 = vld [vmem:[#allocation9 + $0x88] sm:$0xff]   ;;  %v2280_v7 = vld [vmem:[#allocation9 + $0x90] sm:$0xff]  }
 0x166   :  { %v829_v10 = vpop.f32.mrb[3].mxu1  ;;  %v2281_v8 = vld [vmem:[#allocation9 + $0xd8] sm:$0xff]  }
 0x167   :  { %v2282_v9 = vld [vmem:[#allocation9 + $0x98] sm:$0xff]   ;;  %v2283_v10 = vld [vmem:[#allocation9 + $0xe0] sm:$0xff]  }
 0x1a2   :  { %v865_v15 = vpop.f32.mrb[4].mxu0 }
 0x1a3   :  { %v866_v17 = vadd.f32 %v865_v15, %v825_v3  ;;  %v867_v18 = vpop.f32.mrb[5].mxu0  ;;  %v2277_v3 = vld [vmem:[#allocation9 + $0xc8] sm:$0xff]   ;;  %v976_v15 = vrot.slane %v963_v44, %v975_v12 }
 0x1a4   :  { %v868_v19 = vadd.f32 %v867_v18, %v827_v6  ;;  %v869_v20 = vpop.f32.mrb[6].mxu0  ;;  %v2279_v6 = vld [vmem:[#allocation9 + $0xd0] sm:$0xff]  }
 0x1a5   :  { %v893_v21 = vadd.f32 %v886_v14, %v866_v17  ;;  %v870_v22 = vpop.f32.mrb[7].mxu0  ;;  %v2286_v14 = vld [vmem:[#allocation9 + $0xa8] sm:$0xff]   ;;  %v2288_v17 = vld [vmem:[#allocation9 + $0xb0] sm:$0xff]   ;;  %v2290_v20 = vld [vmem:[#allocation9 + $0xb8] sm:$0xff]  }
 0x1a6   :  { %v894_v23 = vadd.f32 %v890_v16, %v868_v19  ;;  %v2287_v16 = vld [vmem:[#allocation9 + $0xf0] sm:$0xff]   ;;  %v2289_v19 = vld [vmem:[#allocation9 + $0xf8] sm:$0xff]  }
 0x1a7   :  { %v895_v24 = vmax.f32 %v893_v21, 0.0 }
 0x1a8   :  { %v896_v25 = vmax.f32 %v894_v23, 0.0 }
 0x1a9   :  { %v897_v28 = vpack.c.bf16 %v895_v24, %v895_v24 }
 0x1aa   :  { %v898_v26 = vpack.c.bf16 %v896_v25, %v896_v25 }
 0x1ac   :  { %1337 = vmatprep.mubr.bf16.mxu1 %v898_v26  ;;  %1378 = vmatprep.mubr.bf16.mxu0 %v898_v26 }
 0x1ad   :  { %1338 = vmatmul.mubr.bf16.vlgmr.msra.gmra.mrb[4].mxu1 %v897_v28  ;;  %1379 = vmatmul.mubr.bf16.vlgmr.msra.gmra.mrb[8].mxu0 %v897_v28 }
 0x1ae   :  { %1952 = vmatpush3.bf16.msra.mxu1 %v2260_v27  ;;  %v1918_v27 = vld [vmem:[%s2555_s6] ss:$0 sm:$0xff] }
 0x1af   :  { %1953 = vmatprep.subr.bf16.mxu1 %v2261_v29 }
 0x1b2   :  { %1954 = vmatpush3.bf16.msra.mxu1 %v2262_v30 }
 0x1b3   :  { %1955 = vmatprep.subr.bf16.mxu1 %v2263_v31 }
 0x1b6   :  { %1956 = vmatpush3.bf16.msra.mxu1 %v2264_v32 }
 0x1b7   :  { %1957 = vmatprep.subr.bf16.mxu1 %v2265_v33 }
 0x1ba   :  { %1958 = vmatpush3.bf16.msra.mxu1 %v2266_v34 }
 0x1bb   :  { %1959 = vmatprep.subr.bf16.mxu1 %v2267_v35 }
 0x1be   :  { %1960 = vmatpush3.bf16.msra.mxu1 %v2268_v36 }
 0x1bf   :  { %1961 = vmatprep.subr.bf16.mxu1 %v2269_v37 }
 0x1c2   :  { %1962 = vmatpush3.bf16.msra.mxu1 %v2270_v38 }
 0x1c3   :  { %1963 = vmatprep.subr.bf16.mxu1 %v2271_v39 }
 0x1c6   :  { %1964 = vmatpush3.bf16.msra.mxu1 %v2272_v40 }
 0x1c7   :  { %1965 = vmatprep.subr.bf16.mxu1 %v2273_v41 }
 0x1ca   :  { %1966 = vmatpush3.bf16.msra.mxu1 %v2274_v42 }
 0x1cb   :  { %1973 = vmatprep.subr.bf16.mxu1 %v2275_v43 }
 0x280   :  { %v1339_v50 = vpop.f32.mrb[4].mxu1  ;;  %v1380_v51 = vpop.f32.mrb[8].mxu0 }
 0x281   :  { %v1340_v52 = vadd.f32 %v1339_v50, %v968_v47  ;;  %v1341_v53 = vpop.f32.mrb[5].mxu1  ;;  %v1382_v54 = vpop.f32.mrb[9].mxu0  ;;  %v1381_v18 = vadd.f32 %v1380_v51, %v976_v15 }
 0x282   :  { %v1342_v55 = vadd.f32 %v1341_v53, %v972_v48  ;;  %v1383_v56 = vadd.f32 %v1382_v54, %v980_v49  ;;  %v1343_v57 = vpop.f32.mrb[6].mxu1  ;;  %v1384_v58 = vpop.f32.mrb[10].mxu0 }
 0x283   :  { %v1387_v59 = vmax.f32 %v1340_v52, 0.0  ;;  %v1344_v60 = vpop.f32.mrb[7].mxu1  ;;  %v1385_v61 = vpop.f32.mrb[11].mxu0  ;;  %v1389_v21 = vmax.f32 %v1381_v18, 0.0 }
 0x284   :  { %v1388_v62 = vmax.f32 %v1342_v55, 0.0  ;;  %v1390_v63 = vmax.f32 %v1383_v56, 0.0 }
 0x285   :  { %v1391_v2 = vpack.c.bf16 %v1387_v59, %v1387_v59  ;;  %v1393_v22 = vpack.c.bf16 %v1389_v21, %v1389_v21 }
 0x286   :  { %v1392_v0 = vpack.c.bf16 %v1388_v62, %v1388_v62  ;;  %v1394_v4 = vpack.c.bf16 %v1390_v63, %v1390_v63 }
 0x288   :  { %1690 = vmatprep.mubr.bf16.mxu1 %v1392_v0 }
 0x289   :  { %1691 = vmatmul.mubr.bf16.vlgmr.msra.gmra.mrb[8].mxu1 %v1391_v2 }
 0x28a   :  { %1974 = vmatpush3.bf16.msra.mxu1 %v2276_v1  ;;  %1730 = vmatprep.mubr.bf16.mxu1 %v1394_v4 }
 0x28b   :  { %1975 = vmatprep.subr.bf16.mxu1 %v2277_v3 }
 0x28e   :  { %1976 = vmatpush3.bf16.msra.mxu1 %v2278_v5 }
 0x28f   :  { %1977 = vmatprep.subr.bf16.mxu1 %v2279_v6 }
 0x292   :  { %1978 = vmatpush3.bf16.msra.mxu1 %v2280_v7 }
 0x293   :  { %1979 = vmatprep.subr.bf16.mxu1 %v2281_v8 }
 0x296   :  { %1980 = vmatpush3.bf16.msra.mxu1 %v2282_v9 }
 0x297   :  { %1981 = vmatprep.subr.bf16.mxu1 %v2283_v10 }
 0x29a   :  { %1982 = vmatpush3.bf16.msra.mxu1 %v2284_v11 }
 0x29b   :  { %1983 = vmatprep.subr.bf16.mxu1 %v2285_v13 }
 0x29e   :  { %1984 = vmatpush3.bf16.msra.mxu1 %v2286_v14 }
 0x29f   :  { %1985 = vmatprep.subr.bf16.mxu1 %v2287_v16 }
 0x2a2   :  { %1986 = vmatpush3.bf16.msra.mxu1 %v2288_v17 }
 0x2a3   :  { %1987 = vmatprep.subr.bf16.mxu1 %v2289_v19 }
 0x2a6   :  { %1988 = vmatpush3.bf16.msra.mxu1 %v2290_v20 }
 0x2a9   :  { %1731 = vmatmul.mubr.bf16.vlgmr.msra.gmra.mrb[12].mxu1 %v1393_v22 }
 0x35c   :  { %v1967_v46 = vpop.f32.mrb[8].mxu1 }
 0x35d   :  { %v1968_v23 = vpop.f32.mrb[9].mxu1 }
 0x35e   :  { %v1969_v24 = vadd.f32 %v1968_v23, %v1967_v46  ;;  %v1970_v25 = vpop.f32.mrb[10].mxu1 }
 0x35f   :  { %v1971_v26 = vpop.f32.mrb[11].mxu1 }
 0x360   :  { %v1693_v30 = vadd.f32 %v1969_v24, %v1918_v27 }
 0x37c   :  { %v1989_v28 = vpop.f32.mrb[12].mxu1 }
 0x37d   :  { %v1990_v29 = vpop.f32.mrb[13].mxu1 }
 0x37e   :  { %v1991_v31 = vadd.f32 %v1990_v29, %v1989_v28  ;;  %v1992_v32 = vpop.f32.mrb[14].mxu1 }
 0x37f   :  { %v1993_v33 = vpop.f32.mrb[15].mxu1 }
 0x380   :  { %v1733_v34 = vadd.f32 %v1991_v31, %v1693_v30 }
 0x382   :  { %1738 = vst [vmem:[#allocation11] sm:$0xff] %v1733_v34 }
 0x383   :  { %1743 = vsyncadd [#allocation5], 96  ;;  %s2422_s11 = smov [#allocation11]  }
 0x384   :  { %s1744_s12 = sshll.u32 %s2422_s11, 4  ;;  %s1745_s12 = int_to_ptr.vmem [resolvable:$true] %s1744_s12 }
 0x385   :  { %s2379_s13 = scalar_lea.vmem %s1745_s12, 32  ;;  %s2383_s14 = scalar_lea.vmem %s1745_s12, 128 }
 0x386   :  { %p2380_p4 = scmp.ne.s32.totalorder %s1745_s12, %s2379_s13  ;;  %p2384_p5 = scmp.lt.s32.totalorder %s1745_s12, %s1745_s12 }
 0x387   :  { %p2385_p6 = scmp.lt.s32.totalorder %s2383_s14, %s2379_s13 }
 0x389   :  { %p2386_p7 = por %p2385_p6, %p2384_p5 }
 0x38b   :  { %p2387_p8 = pnand %p2386_p7, %p2380_p4 }
 0x38d   :  { %2390 = shalt.err (!%p2387_p8)
}
 0x38e   :  { %s2391_s0 = scalar_lea.hbm %s2556_s7, 32 }
 0x38f   :  { %p2392_p9 = scmp.ne.s32.totalorder %s2556_s7, %s2391_s0  ;;  %p2395_p10 = scmp.lt.u32.totalorder %s2391_s0, %s2556_s7 }
 0x391   :  { %p2397_p11 = pnand %p2395_p10, %p2392_p9 }
 0x393   :  { %2400 = shalt.err (!%p2397_p11)
}
 0x394   :  { %s2423_s20 = smov 32   ;;  %s2424_s21 = smov 2  }
 0x395   :  { %1750 = dma.vmem_to_hbm [thread:$0]  %s1745_s12, 32, %s2556_s7, [#allocation5], %s2423_s20, %s2423_s20, %s2424_s21  }
 0x396   :  { %2407 = dma.done.wait [#allocation5], 128  }
 0x397   :  { %2408 = vsyncadd [#allocation5], 4294967168 }
 0x398   :  { %1754 = vsyncpa [#allocation4], 1 }
 0x399   :  { %1755 = vsyncpa [#allocation7], 1 }
 0x39a   :  { %1756 = vsyncpa [#allocation10], 1 }
 0x39b   :  { %1757 = vsyncpa [#allocation5], 1 }

</bundles_post_ra>
